<compile_context>
chip_gen: v5e
topology: v5e:2x2
jax: 0.10.0
libtpu: 0.0.40
codegen_flags: <defaults>
</compile_context>

<pallas_src>
import functools

import jax
import jax.numpy as jnp
from jax.experimental import pallas as pl
from jax.experimental.pallas import tpu as pltpu


def conv_relu_kernel(x_ref, w_ref, b_ref, o_ref, xpad_ref, col_ref, *,
                     kh_size, kw_size, pad, oh, ow):
    # x_ref   : (1, H, W, Cin)       one input image (NHWC, unpadded), f32
    # w_ref   : (Cout, KH*KW*Cin)    im2col weights, bf16
    # b_ref   : (Cout, 1)            bias, f32
    # o_ref   : (1, Cout, OH*OW)     lane-dense output slab
    # xpad_ref: (H+2p, W+2p, Cin)    VMEM scratch: zero-padded image, f32
    # col_ref : (KH*KW*Cin, OH*OW)   VMEM scratch: im2col matrix, f32
    _, h, w, c_in = x_ref.shape

    # In-kernel zero padding (no jnp.pad HBM round trip in the wrapper).
    xpad_ref[...] = jnp.zeros_like(xpad_ref)
    xpad_ref[pad:pad + h, pad:pad + w, :] = x_ref[0].astype(xpad_ref.dtype)

    # im2col: each of the KH*KW shifted windows becomes Cin rows of the (K, OH*OW)
    # column matrix, so one big-K matmul replaces KH*KW tiny K=Cin matmuls.
    # (The reshape merges OH into the sublane dim -- cheap since OW is a multiple of 8;
    #  the small 2-D transpose is XLU work that buys dense MXU columns + dense stores.)
    for kh in range(kh_size):
        for kw in range(kw_size):
            t = kh * kw_size + kw
            patch = xpad_ref[kh:kh + oh, kw:kw + ow, :]        # (OH, OW, Cin)
            patch = patch.reshape(oh * ow, c_in).T             # (Cin, OH*OW)
            col_ref[t * c_in:(t + 1) * c_in, :] = patch

    # One MXU matmul: (Cout, K) @ (K, OH*OW) -> (Cout, OH*OW).
    # bf16 operands, f32 accumulation; OH*OW (=256 here) lanes keep the MXU columns
    # full and make every output store unmasked/lane-dense.
    acc = jnp.dot(w_ref[...], col_ref[...].astype(w_ref.dtype),
                  preferred_element_type=jnp.float32)
    acc = acc + b_ref[...]                                     # bias, lane-broadcast
    o_ref[0] = jnp.maximum(acc, 0.0).astype(o_ref.dtype)       # fused ReLU


def basic_conv2d(x_nchw, weight_oihw, bias, padding=0):
    """Conv2d(stride=1, padding=padding) + ReLU, matching PyTorch BasicConv2d."""
    n, c_in, h, w = x_nchw.shape
    c_out, c_in_w, kh, kw = weight_oihw.shape
    assert c_in == c_in_w
    oh = h + 2 * padding - kh + 1
    ow = w + 2 * padding - kw + 1
    hp, wp = h + 2 * padding, w + 2 * padding
    kk = kh * kw * c_in

    # Glue (all tiny): NCHW -> NHWC for the input; OIHW -> (Cout, KH*KW*Cin) im2col
    # weights in bf16; bias as a (Cout, 1) column for lane-broadcast.
    x_nhwc = jnp.transpose(x_nchw, (0, 2, 3, 1))
    w_col = jnp.transpose(weight_oihw, (0, 2, 3, 1)).reshape(c_out, kk)
    w_col = w_col.astype(jnp.bfloat16)
    b_col = bias.reshape(c_out, 1).astype(jnp.float32)

    kernel = functools.partial(conv_relu_kernel, kh_size=kh, kw_size=kw,
                               pad=padding, oh=oh, ow=ow)

    out_flat = pl.pallas_call(
        kernel,
        out_shape=jax.ShapeDtypeStruct((n, c_out, oh * ow), x_nchw.dtype),
        grid=(n,),
        in_specs=[
            pl.BlockSpec((1, h, w, c_in), lambda i: (i, 0, 0, 0)),
            pl.BlockSpec((c_out, kk), lambda i: (0, 0)),
            pl.BlockSpec((c_out, 1), lambda i: (0, 0)),
        ],
        out_specs=pl.BlockSpec((1, c_out, oh * ow), lambda i: (i, 0, 0)),
        scratch_shapes=[
            pltpu.VMEM((hp, wp, c_in), jnp.float32),      # zero-padded image
            pltpu.VMEM((kk, oh * ow), jnp.float32),       # im2col matrix
        ],
        compiler_params=pltpu.CompilerParams(
            dimension_semantics=("parallel",)),           # megacore on v7x
    )(x_nhwc, w_col, b_col)

    # (N, Cout, OH*OW) -> (N, Cout, OH, OW): contiguous reshape, no transpose pass.
    return out_flat.reshape(n, c_out, oh, ow)


if __name__ == "__main__":
    # Module config: BasicConv2d(in_channels=4, out_channels=8, kernel_size=3, padding=1)
    N, C_IN, H, W = 2, 4, 16, 16
    C_OUT, K, PAD = 8, 3, 1

    key = jax.random.PRNGKey(0)
    kx, kwt, kb = jax.random.split(key, 3)

    x = jax.random.normal(kx, (N, C_IN, H, W), dtype=jnp.float32)
    # Deterministic, PyTorch-like uniform init bound = 1/sqrt(fan_in)
    bound = 1.0 / (C_IN * K * K) ** 0.5
    weight = jax.random.uniform(kwt, (C_OUT, C_IN, K, K),
                                minval=-bound, maxval=bound, dtype=jnp.float32)
    bias = jax.random.uniform(kb, (C_OUT,),
                              minval=-bound, maxval=bound, dtype=jnp.float32)

    out = basic_conv2d(x, weight, bias, padding=PAD)
    out = jax.block_until_ready(out)

    # Reference with the same bf16 operand cast + f32 accumulation as the kernel.
    ref = jax.lax.conv_general_dilated(
        x.astype(jnp.bfloat16), weight.astype(jnp.bfloat16),
        window_strides=(1, 1),
        padding=((PAD, PAD), (PAD, PAD)),
        dimension_numbers=("NCHW", "OIHW", "NCHW"),
        preferred_element_type=jnp.float32)
    ref = jnp.maximum(ref + bias[None, :, None, None], 0.0)

    assert out.shape == (N, C_OUT, H, W), out.shape
    assert jnp.allclose(out, ref, atol=2e-2, rtol=2e-2), \
        float(jnp.max(jnp.abs(out - ref)))

    print("KERNEL_OK")
</pallas_src>

<mosaic_0001>
module attributes {stable_mosaic.version = 11 : i64} {
  func.func @conv_relu_kernel(%arg0: i32, %arg1: memref<1x16x16x4xf32, #tpu.memory_space<vmem>>, %arg2: memref<8x36xbf16, #tpu.memory_space<vmem>>, %arg3: memref<8x1xf32, #tpu.memory_space<vmem>>, %arg4: memref<1x8x256xf32, #tpu.memory_space<vmem>>, %arg5: memref<18x18x4xf32, #tpu.memory_space<vmem>>, %arg6: memref<36x256xf32, #tpu.memory_space<vmem>>) attributes {dimension_semantics = [#tpu.dimension_semantics<parallel>], iteration_bounds = array<i64: 2>, scalar_prefetch = 0 : i64, scratch_operands = 2 : i64, tpu.core_type = #tpu.core_type<tc>, window_params = [{transform_indices = @transform_0, window_bounds = array<i64: 1, 16, 16, 4>}, {pipeline_mode = #tpu.pipeline_mode<synchronous>, transform_indices = @transform_1, window_bounds = array<i64: 8, 36>}, {pipeline_mode = #tpu.pipeline_mode<synchronous>, transform_indices = @transform_2, window_bounds = array<i64: 8, 1>}, {transform_indices = @transform_3, window_bounds = array<i64: 1, 8, 256>}]} {
    %cst = arith.constant 0.000000e+00 : f32
    %0 = vector.broadcast %cst : f32 to vector<18x18x4xf32>
    %c0 = arith.constant 0 : index
    %c0_0 = arith.constant 0 : index
    %c0_1 = arith.constant 0 : index
    %1 = vector.load %arg5[%c0, %c0_0, %c0_1] : memref<18x18x4xf32, #tpu.memory_space<vmem>>, vector<18x18x4xf32>
    tpu.vector_store %arg5[%c0, %c0_0, %c0_1], %0 {strides = array<i32>} : memref<18x18x4xf32, #tpu.memory_space<vmem>>, vector<18x18x4xf32>,
    %c0_2 = arith.constant 0 : index
    %c0_3 = arith.constant 0 : index
    %c0_4 = arith.constant 0 : index
    %c0_5 = arith.constant 0 : index
    %2 = vector.load %arg1[%c0_2, %c0_3, %c0_4, %c0_5] : memref<1x16x16x4xf32, #tpu.memory_space<vmem>>, vector<1x16x16x4xf32>
    %3 = vector.shape_cast %2 : vector<1x16x16x4xf32> to vector<16x16x4xf32>
    %c1 = arith.constant 1 : index
    %c1_6 = arith.constant 1 : index
    %c0_7 = arith.constant 0 : index
    %4 = vector.load %arg5[%c1, %c1_6, %c0_7] : memref<18x18x4xf32, #tpu.memory_space<vmem>>, vector<16x16x4xf32>
    tpu.vector_store %arg5[%c1, %c1_6, %c0_7], %3 {strides = array<i32>} : memref<18x18x4xf32, #tpu.memory_space<vmem>>, vector<16x16x4xf32>,
    %c0_8 = arith.constant 0 : index
    %c0_9 = arith.constant 0 : index
    %c0_10 = arith.constant 0 : index
    %5 = vector.load %arg5[%c0_8, %c0_9, %c0_10] : memref<18x18x4xf32, #tpu.memory_space<vmem>>, vector<16x16x4xf32>
    %6 = vector.shape_cast %5 : vector<16x16x4xf32> to vector<256x4xf32>
    %7 = tpu.transpose %6, [1, 0] : vector<256x4xf32> -> vector<4x256xf32>
    %c0_11 = arith.constant 0 : index
    %c0_12 = arith.constant 0 : index
    %8 = vector.load %arg6[%c0_11, %c0_12] : memref<36x256xf32, #tpu.memory_space<vmem>>, vector<4x256xf32>
    tpu.vector_store %arg6[%c0_11, %c0_12], %7 {strides = array<i32>} : memref<36x256xf32, #tpu.memory_space<vmem>>, vector<4x256xf32>,
    %c0_13 = arith.constant 0 : index
    %c1_14 = arith.constant 1 : index
    %c0_15 = arith.constant 0 : index
    %9 = vector.load %arg5[%c0_13, %c1_14, %c0_15] : memref<18x18x4xf32, #tpu.memory_space<vmem>>, vector<16x16x4xf32>
    %10 = vector.shape_cast %9 : vector<16x16x4xf32> to vector<256x4xf32>
    %11 = tpu.transpose %10, [1, 0] : vector<256x4xf32> -> vector<4x256xf32>
    %c4 = arith.constant 4 : index
    %c0_16 = arith.constant 0 : index
    %12 = vector.load %arg6[%c4, %c0_16] : memref<36x256xf32, #tpu.memory_space<vmem>>, vector<4x256xf32>
    tpu.vector_store %arg6[%c4, %c0_16], %11 {strides = array<i32>} : memref<36x256xf32, #tpu.memory_space<vmem>>, vector<4x256xf32>,
    %c0_17 = arith.constant 0 : index
    %c2 = arith.constant 2 : index
    %c0_18 = arith.constant 0 : index
    %13 = vector.load %arg5[%c0_17, %c2, %c0_18] : memref<18x18x4xf32, #tpu.memory_space<vmem>>, vector<16x16x4xf32>
    %14 = vector.shape_cast %13 : vector<16x16x4xf32> to vector<256x4xf32>
    %15 = tpu.transpose %14, [1, 0] : vector<256x4xf32> -> vector<4x256xf32>
    %c8 = arith.constant 8 : index
    %c0_19 = arith.constant 0 : index
    %16 = vector.load %arg6[%c8, %c0_19] : memref<36x256xf32, #tpu.memory_space<vmem>>, vector<4x256xf32>
    tpu.vector_store %arg6[%c8, %c0_19], %15 {strides = array<i32>} : memref<36x256xf32, #tpu.memory_space<vmem>>, vector<4x256xf32>,
    %c1_20 = arith.constant 1 : index
    %c0_21 = arith.constant 0 : index
    %c0_22 = arith.constant 0 : index
    %17 = vector.load %arg5[%c1_20, %c0_21, %c0_22] : memref<18x18x4xf32, #tpu.memory_space<vmem>>, vector<16x16x4xf32>
    %18 = vector.shape_cast %17 : vector<16x16x4xf32> to vector<256x4xf32>
    %19 = tpu.transpose %18, [1, 0] : vector<256x4xf32> -> vector<4x256xf32>
    %c12 = arith.constant 12 : index
    %c0_23 = arith.constant 0 : index
    %20 = vector.load %arg6[%c12, %c0_23] : memref<36x256xf32, #tpu.memory_space<vmem>>, vector<4x256xf32>
    tpu.vector_store %arg6[%c12, %c0_23], %19 {strides = array<i32>} : memref<36x256xf32, #tpu.memory_space<vmem>>, vector<4x256xf32>,
    %c1_24 = arith.constant 1 : index
    %c1_25 = arith.constant 1 : index
    %c0_26 = arith.constant 0 : index
    %21 = vector.load %arg5[%c1_24, %c1_25, %c0_26] : memref<18x18x4xf32, #tpu.memory_space<vmem>>, vector<16x16x4xf32>
    %22 = vector.shape_cast %21 : vector<16x16x4xf32> to vector<256x4xf32>
    %23 = tpu.transpose %22, [1, 0] : vector<256x4xf32> -> vector<4x256xf32>
    %c16 = arith.constant 16 : index
    %c0_27 = arith.constant 0 : index
    %24 = vector.load %arg6[%c16, %c0_27] : memref<36x256xf32, #tpu.memory_space<vmem>>, vector<4x256xf32>
    tpu.vector_store %arg6[%c16, %c0_27], %23 {strides = array<i32>} : memref<36x256xf32, #tpu.memory_space<vmem>>, vector<4x256xf32>,
    %c1_28 = arith.constant 1 : index
    %c2_29 = arith.constant 2 : index
    %c0_30 = arith.constant 0 : index
    %25 = vector.load %arg5[%c1_28, %c2_29, %c0_30] : memref<18x18x4xf32, #tpu.memory_space<vmem>>, vector<16x16x4xf32>
    %26 = vector.shape_cast %25 : vector<16x16x4xf32> to vector<256x4xf32>
    %27 = tpu.transpose %26, [1, 0] : vector<256x4xf32> -> vector<4x256xf32>
    %c20 = arith.constant 20 : index
    %c0_31 = arith.constant 0 : index
    %28 = vector.load %arg6[%c20, %c0_31] : memref<36x256xf32, #tpu.memory_space<vmem>>, vector<4x256xf32>
    tpu.vector_store %arg6[%c20, %c0_31], %27 {strides = array<i32>} : memref<36x256xf32, #tpu.memory_space<vmem>>, vector<4x256xf32>,
    %c2_32 = arith.constant 2 : index
    %c0_33 = arith.constant 0 : index
    %c0_34 = arith.constant 0 : index
    %29 = vector.load %arg5[%c2_32, %c0_33, %c0_34] : memref<18x18x4xf32, #tpu.memory_space<vmem>>, vector<16x16x4xf32>
    %30 = vector.shape_cast %29 : vector<16x16x4xf32> to vector<256x4xf32>
    %31 = tpu.transpose %30, [1, 0] : vector<256x4xf32> -> vector<4x256xf32>
    %c24 = arith.constant 24 : index
    %c0_35 = arith.constant 0 : index
    %32 = vector.load %arg6[%c24, %c0_35] : memref<36x256xf32, #tpu.memory_space<vmem>>, vector<4x256xf32>
    tpu.vector_store %arg6[%c24, %c0_35], %31 {strides = array<i32>} : memref<36x256xf32, #tpu.memory_space<vmem>>, vector<4x256xf32>,
    %c2_36 = arith.constant 2 : index
    %c1_37 = arith.constant 1 : index
    %c0_38 = arith.constant 0 : index
    %33 = vector.load %arg5[%c2_36, %c1_37, %c0_38] : memref<18x18x4xf32, #tpu.memory_space<vmem>>, vector<16x16x4xf32>
    %34 = vector.shape_cast %33 : vector<16x16x4xf32> to vector<256x4xf32>
    %35 = tpu.transpose %34, [1, 0] : vector<256x4xf32> -> vector<4x256xf32>
    %c28 = arith.constant 28 : index
    %c0_39 = arith.constant 0 : index
    %36 = vector.load %arg6[%c28, %c0_39] : memref<36x256xf32, #tpu.memory_space<vmem>>, vector<4x256xf32>
    tpu.vector_store %arg6[%c28, %c0_39], %35 {strides = array<i32>} : memref<36x256xf32, #tpu.memory_space<vmem>>, vector<4x256xf32>,
    %c2_40 = arith.constant 2 : index
    %c2_41 = arith.constant 2 : index
    %c0_42 = arith.constant 0 : index
    %37 = vector.load %arg5[%c2_40, %c2_41, %c0_42] : memref<18x18x4xf32, #tpu.memory_space<vmem>>, vector<16x16x4xf32>
    %38 = vector.shape_cast %37 : vector<16x16x4xf32> to vector<256x4xf32>
    %39 = tpu.transpose %38, [1, 0] : vector<256x4xf32> -> vector<4x256xf32>
    %c32 = arith.constant 32 : index
    %c0_43 = arith.constant 0 : index
    %40 = vector.load %arg6[%c32, %c0_43] : memref<36x256xf32, #tpu.memory_space<vmem>>, vector<4x256xf32>
    tpu.vector_store %arg6[%c32, %c0_43], %39 {strides = array<i32>} : memref<36x256xf32, #tpu.memory_space<vmem>>, vector<4x256xf32>,
    %c0_44 = arith.constant 0 : index
    %c0_45 = arith.constant 0 : index
    %41 = vector.load %arg2[%c0_44, %c0_45] : memref<8x36xbf16, #tpu.memory_space<vmem>>, vector<8x36xbf16>
    %c0_46 = arith.constant 0 : index
    %c0_47 = arith.constant 0 : index
    %42 = vector.load %arg6[%c0_46, %c0_47] : memref<36x256xf32, #tpu.memory_space<vmem>>, vector<36x256xf32>
    %43 = arith.truncf %42 : vector<36x256xf32> to vector<36x256xbf16>
    %cst_48 = arith.constant dense<0.000000e+00> : vector<8x256xf32>
    %44 = tpu.matmul %41, %43, %cst_48 {dimension_numbers = #tpu.dot_dimension_numbers<[1], [0], [0], [1], [0, 0, 1, 1], [], []>} : vector<8x36xbf16>, vector<36x256xbf16>, vector<8x256xf32> -> vector<8x256xf32>
    %c0_49 = arith.constant 0 : index
    %c0_50 = arith.constant 0 : index
    %45 = vector.load %arg3[%c0_49, %c0_50] : memref<8x1xf32, #tpu.memory_space<vmem>>, vector<8x1xf32>
    %46 = vector.broadcast %45 : vector<8x1xf32> to vector<8x256xf32>
    %47 = arith.addf %44, %46 : vector<8x256xf32>
    %cst_51 = arith.constant 0.000000e+00 : f32
    %48 = vector.broadcast %cst_51 : f32 to vector<8x256xf32>
    %49 = arith.maximumf %47, %48 : vector<8x256xf32>
    %c0_52 = arith.constant 0 : index
    %c0_53 = arith.constant 0 : index
    %c0_54 = arith.constant 0 : index
    %50 = vector.load %arg4[%c0_52, %c0_53, %c0_54] : memref<1x8x256xf32, #tpu.memory_space<vmem>>, vector<1x8x256xf32>
    %51 = vector.shape_cast %50 : vector<1x8x256xf32> to vector<8x256xf32>
    %52 = vector.shape_cast %49 : vector<8x256xf32> to vector<1x8x256xf32>
    tpu.vector_store %arg4[%c0_52, %c0_53, %c0_54], %52 {strides = array<i32>} : memref<1x8x256xf32, #tpu.memory_space<vmem>>, vector<1x8x256xf32>,
    return
  }
  func.func @transform_0(%arg0: i32) -> (i32, i32, i32, i32) {
    %c0_i32 = arith.constant 0 : i32
    %c0_i32_0 = arith.constant 0 : i32
    %c0_i32_1 = arith.constant 0 : i32
    %c0_i32_2 = arith.constant 0 : i32
    return %arg0, %c0_i32, %c0_i32_0, %c0_i32_1 : i32, i32, i32, i32
  }
  func.func @transform_1(%arg0: i32) -> (i32, i32) {
    %c0_i32 = arith.constant 0 : i32
    %c0_i32_0 = arith.constant 0 : i32
    %c0_i32_1 = arith.constant 0 : i32
    return %c0_i32, %c0_i32_0 : i32, i32
  }
  func.func @transform_2(%arg0: i32) -> (i32, i32) {
    %c0_i32 = arith.constant 0 : i32
    %c0_i32_0 = arith.constant 0 : i32
    %c0_i32_1 = arith.constant 0 : i32
    return %c0_i32, %c0_i32_0 : i32, i32
  }
  func.func @transform_3(%arg0: i32) -> (i32, i32, i32) {
    %c0_i32 = arith.constant 0 : i32
    %c0_i32_0 = arith.constant 0 : i32
    %c0_i32_1 = arith.constant 0 : i32
    return %arg0, %c0_i32, %c0_i32_0 : i32, i32, i32
  }
}

</mosaic_0001>

<bundles_post_ra>
// kernel: tpu_custom_call.1
= control target key start
LH: loop header
LB: loop body
LE: loop exit
PB: predicated region body
PF: predicated region fallthrough
CT: control target
= control target key end

     0   :  { %8 = vsyncpa [#allocation5], 0  ;;  %s2215_s0 = inlined_call_operand.vmem [shape: f32[2,16,16,4], index: 0, kind: input, shape index: {}]   ;;  %s2216_s1 = inlined_call_operand.vmem [shape: bf16[8,36], index: 1, kind: input, shape index: {}]   ;;  %s2217_s2 = inlined_call_operand.vmem [shape: f32[8,1], index: 2, kind: input, shape index: {}]   ;;  %s2218_s3 = inlined_call_operand.hbm [shape: f32[2,8,256], index: 3, kind: output, shape index: {}]  }
   0x1   :  { %10 = vsyncpa [#allocation5 + $0x1], 0  ;;  %s1482_s12 = smov 0   ;;  %s1484_s13 = smov 0  }
   0x2   :  { %s1486_s14 = smov 0   ;;  %s1488_s15 = smov 0  }
   0x3 LB: > { %s1503_s16 = sadd.s32 4294967295, %s1458_s15   ;;  %s1338_s17 = sadd.s32 4294967294, %s1458_s15   ;;  %s1458_s15 = sphi %s1488_s15, %s2370_s15   ;;  %s1454_s14 = sphi %s1486_s14, %s2369_s14   ;;  %s1450_s13 = sphi %s1484_s13, %s2368_s13   ;;  %s1446_s12 = sphi %s1482_s12, %s2367_s12  }
   0x4   : > { %s1507_s18 = sadd.s32 1, %s1458_s15   ;;  %s91_s19 = sadd.s32 1, %s1454_s14 }
   0x5   : > { %s88_s20 = ssub.s32 %s1458_s15, %s1507_s18  ;;  %p101_p0 = scmp.ne.s32.totalorder %s1454_s14, %s1450_s13 }
   0x6   : > { %p89_p1 = scmp.eq.s32.totalorder %s88_s20, 0  ;;  %p102_p2 = scmp.eq.s32.totalorder %s1503_s16, 1 }
   0x7   : > { %p107_p3 = scmp.ne.s32.totalorder %s1450_s13, %s1446_s12  ;;  %p108_p4 = scmp.eq.s32.totalorder %s1338_s17, 1 }
   0x8   : > { %s1518_s21 = scalar_select %p89_p1, %s1454_s14, %s91_s19  }
   0x9   : > { %p1520_p5 = por %p102_p2, %p101_p0  ;;  %p1524_p6 = por %p108_p4, %p107_p3 }
   0xa   : > { %p1341_p7 = scmp.ge.s32.totalorder %s1458_s15, 1  ;;  %p140_p8 = scmp.lt.s32.totalorder %s1458_s15, 3 }
   0xc   : > { %p141_p9 = pnand %p1341_p7, %p140_p8 }
   0xe   : > { %144 = sbr.rel (%p141_p9) target bundleno = 1061 (0x425), region = 32 }
  0x13   : > { %vm170_vm0 = vcmask 31744   ;;  %v1460_v0 = vmov 0.0   ;;  %p164_p10 = scmp.lt.s32.totalorder %s1503_s16, 1  ;;  %vm173_vm1 = vcmask 25600   ;;  %vm1225_vm2 = vcmask 1041408   ;;  %s161_s6 = sand.u32 1, %s1450_s13  }
  0x14   : > { %171 = vst.msk [vmem:[#allocation2] sm:$0xff] %vm170_vm0, %v1460_v0  ;;  %vm1221_vm3 = vcmask 293888   ;;  %s1342_s7 = sshll.u32 %s161_s6, 4  ;;  %s1353_s8 = sshll.u32 %s1503_s16, 4 }
  0x15   : > { %172 = vst.msk [vmem:[#allocation2 + $0x8] sm:$0xff] %vm170_vm0, %v1460_v0  ;;  %s165_s24 = scalar_select %p164_p10, %s1503_s16, 1 }
  0x16   : > { %175 = vst.msk [vmem:[#allocation2 + $0x18] sm:$0xff] %vm170_vm0, %v1460_v0  ;;  %s1274_s11 = scalar_lea.hbm %s2218_s3, %s1353_s8  ;;  %s163_s17 = scalar_lea.vmem [#allocation4], %s1342_s7 }
  0x17   : > { %176 = vst.msk [vmem:[#allocation2 + $0x20] sm:$0xff] %vm170_vm0, %v1460_v0  ;;  %s1352_s25 = sshll.u32 %s165_s24, 8  ;;  %s1276_s19 = sshll.u32 %s163_s17, 4  ;;  %s1277_s19 = int_to_ptr.vmem [resolvable:$true] %s1276_s19 }
  0x18   : > { %178 = vst.msk [vmem:[#allocation2 + $0x30] sm:$0xff] %vm170_vm0, %v1460_v0  ;;  %s1597_s28 = scalar_lea.vmem %s2215_s0, %s1352_s25  ;;  %s1278_s20 = sshll.u32 %s1274_s11, 4  ;;  %s1279_s20 = int_to_ptr.hbm [resolvable:$true] %s1278_s20 }
  0x19   : > { %179 = vst.msk [vmem:[#allocation2 + $0x38] sm:$0xff] %vm170_vm0, %v1460_v0  ;;  %v240_v4 = vld [vmem:[%s1597_s28 + $0x70] sm:$0xff]  ;;  %v241_v5 = vld [vmem:[%s1597_s28 + $0x78] sm:$0xff]  ;;  %v226_v9 = vld [vmem:[%s1597_s28] sm:$0xff]  ;;  %s1263_s24 = scalar_lea.sflag [#allocation5], %s161_s6  ;;  %s1410_s25 = sshra.s32 %s1279_s20, 4  ;;  %s1411_s25 = int_to_ptr.hbm [resolvable:$true] %s1410_s25 }
  0x1a   : > { %181 = vst.msk [vmem:[#allocation2 + $0x48] sm:$0xff] %vm170_vm0, %v1460_v0  ;;  %v242_v10 = vld [vmem:[%s1597_s28 + $0x80] sm:$0xff]  ;;  %v227_v11 = vld [vmem:[%s1597_s28 + $0x8] sm:$0xff]  ;;  %v228_v13 = vld [vmem:[%s1597_s28 + $0x10] sm:$0xff]  ;;  %s1412_s16 = scalar_lea.hbm %s1411_s25, 16  ;;  %p1417_p0 = scmp.lt.s32.totalorder %s1411_s25, %s2218_s3 }
  0x1b   : > { %v291_v1 = vld [vmem:[#allocation2] sm:$0xff]  ;;  %182 = vst.msk [vmem:[#allocation2 + $0x50] sm:$0xff] %vm170_vm0, %v1460_v0  ;;  %v243_v12 = vld [vmem:[%s1597_s28 + $0x88] sm:$0xff]  ;;  %v244_v14 = vld [vmem:[%s1597_s28 + $0x90] sm:$0xff]  ;;  %p1413_p11 = scmp.ne.s32.totalorder %s1411_s25, %s1412_s16 }
  0x1c   : > { %323 = vxpose.xlu0.b32.start [1/16] (narrow) %v291_v1, 8  ;;  %184 = vst.msk [vmem:[#allocation2 + $0x60] sm:$0xff] %vm170_vm0, %v1460_v0  ;;  %v389_v2 = vld [vmem:[#allocation2 + $0x1] sm:$0xff]  ;;  %v229_v15 = vld [vmem:[%s1597_s28 + $0x18] sm:$0xff]  ;;  %v232_v27 = vld [vmem:[%s1597_s28 + $0x30] sm:$0xff] }
  0x1d   : > { %185 = vst.msk [vmem:[#allocation2 + $0x68] sm:$0xff] %vm170_vm0, %v1460_v0  ;;  %421 = vxpose.xlu2.b32.start [1/16] (narrow) %v389_v2, 8  ;;  %v292_v3 = vld [vmem:[#allocation2 + $0x8] sm:$0xff]  ;;  %v245_v16 = vld [vmem:[%s1597_s28 + $0x98] sm:$0xff]  ;;  %v230_v17 = vld [vmem:[%s1597_s28 + $0x20] sm:$0xff]  ;;  %p1414_p12 = pnand %p1413_p11, %p1520_p5 }
  0x1e   : > { %187 = vst.msk [vmem:[#allocation2 + $0x78] sm:$0xff] %vm170_vm0, %v1460_v0  ;;  %v246_v18 = vld [vmem:[%s1597_s28 + $0xa0] sm:$0xff]  ;;  %v231_v21 = vld [vmem:[%s1597_s28 + $0x28] sm:$0xff]  ;;  %v248_v30 = vld [vmem:[%s1597_s28 + $0xb0] sm:$0xff] }
  0x1f   : > { %188 = vst.msk [vmem:[#allocation2 + $0x80] sm:$0xff] %vm170_vm0, %v1460_v0  ;;  %v247_v25 = vld [vmem:[%s1597_s28 + $0xa8] sm:$0xff]  ;;  %v233_v32 = vld [vmem:[%s1597_s28 + $0x38] sm:$0xff]  ;;  %v234_v37 = vld [vmem:[%s1597_s28 + $0x40] sm:$0xff]  ;;  %p1415_p13 = pneg %p1414_p12 }
  0x20   : > { %190 = vst.msk [vmem:[#allocation2 + $0x90] sm:$0xff] %vm170_vm0, %v1460_v0  ;;  %v249_v35 = vld [vmem:[%s1597_s28 + $0xb8] sm:$0xff]  ;;  %v250_v40 = vld [vmem:[%s1597_s28 + $0xc0] sm:$0xff]  ;;  %v235_v42 = vld [vmem:[%s1597_s28 + $0x48] sm:$0xff] }
  0x21   : > { %191 = vst.msk [vmem:[#allocation2 + $0x98] sm:$0xff] %vm170_vm0, %v1460_v0  ;;  %v251_v45 = vld [vmem:[%s1597_s28 + $0xc8] sm:$0xff]  ;;  %v236_v47 = vld [vmem:[%s1597_s28 + $0x50] sm:$0xff]  ;;  %v237_v52 = vld [vmem:[%s1597_s28 + $0x58] sm:$0xff] }
  0x22   : > { %193 = vst.msk [vmem:[#allocation2 + $0xa8] sm:$0xff] %vm170_vm0, %v1460_v0  ;;  %v252_v50 = vld [vmem:[%s1597_s28 + $0xd0] sm:$0xff]  ;;  %v253_v55 = vld [vmem:[%s1597_s28 + $0xd8] sm:$0xff]  ;;  %v238_v57 = vld [vmem:[%s1597_s28 + $0x60] sm:$0xff] }
  0x23   : > { %194 = vst.msk [vmem:[#allocation2 + $0xb0] sm:$0xff] %vm170_vm0, %v1460_v0  ;;  %v254_v60 = vld [vmem:[%s1597_s28 + $0xe0] sm:$0xff]  ;;  %v239_v62 = vld [vmem:[%s1597_s28 + $0x68] sm:$0xff] }
  0x24   : > { %196 = vst.msk [vmem:[#allocation2 + $0xc0] sm:$0xff] %vm170_vm0, %v1460_v0  ;;  %324 = vxpose.xlu0.b32.cont [2/16] (narrow) %v292_v3, 8  ;;  %v255_v1 = vld [vmem:[%s1597_s28 + $0xe8] sm:$0xff] }
  0x25   : > { %197 = vst.msk [vmem:[#allocation2 + $0xc8] sm:$0xff] %vm170_vm0, %v1460_v0 }
  0x26   : > { %199 = vst.msk [vmem:[#allocation2 + $0xd8] sm:$0xff] %vm170_vm0, %v1460_v0 }
  0x27   : > { %200 = vst.msk [vmem:[#allocation2 + $0xe0] sm:$0xff] %vm170_vm0, %v1460_v0 }
  0x28   : > { %202 = vst.msk [vmem:[#allocation2 + $0xf0] sm:$0xff] %vm170_vm0, %v1460_v0 }
  0x29   : > { %203 = vst.msk [vmem:[#allocation2 + $0xf8] sm:$0xff] %vm170_vm0, %v1460_v0 }
  0x2a   : > { %205 = vst.msk [vmem:[#allocation2 + $0x108] sm:$0xff] %vm170_vm0, %v1460_v0 }
  0x2b   : > { %206 = vst.msk [vmem:[#allocation2 + $0x110] sm:$0xff] %vm170_vm0, %v1460_v0 }
  0x2c   : > { %208 = vst.msk [vmem:[#allocation2 + $0x120] sm:$0xff] %vm170_vm0, %v1460_v0 }
  0x2d   : > { %209 = vst.msk [vmem:[#allocation2 + $0x128] sm:$0xff] %vm170_vm0, %v1460_v0 }
  0x2e   : > { %211 = vst.msk [vmem:[#allocation2 + $0x138] sm:$0xff] %vm170_vm0, %v1460_v0 }
  0x2f   : > { %212 = vst.msk [vmem:[#allocation2 + $0x140] sm:$0xff] %vm170_vm0, %v1460_v0 }
  0x30   : > { %214 = vst.msk [vmem:[#allocation2 + $0x150] sm:$0xff] %vm170_vm0, %v1460_v0 }
  0x31   : > { %215 = vst.msk [vmem:[#allocation2 + $0x158] sm:$0xff] %vm170_vm0, %v1460_v0 }
  0x32   : > { %217 = vst.msk [vmem:[#allocation2 + $0x168] sm:$0xff] %vm170_vm0, %v1460_v0 }
  0x33   : > { %218 = vst.msk [vmem:[#allocation2 + $0x170] sm:$0xff] %vm170_vm0, %v1460_v0 }
  0x34   : > { %220 = vst.msk [vmem:[#allocation2 + $0x180] sm:$0xff] %vm170_vm0, %v1460_v0 }
  0x35   : > { %221 = vst.msk [vmem:[#allocation2 + $0x188] sm:$0xff] %vm170_vm0, %v1460_v0 }
  0x36   : > { %223 = vst.msk [vmem:[#allocation2 + $0x198] sm:$0xff] %vm170_vm0, %v1460_v0 }
  0x37   : > { %224 = vst.msk [vmem:[#allocation2 + $0x1a0] sm:$0xff] %vm170_vm0, %v1460_v0 }
  0x38   : > { %273 = vst.msk [vmem:[#allocation2 + $0xc1] sm:$0xff] %vm170_vm0, %v240_v4 }
  0x39   : > { %198 = vst.msk [vmem:[#allocation2 + $0xd0] sm:$0x3] %vm173_vm1, %v1460_v0 }
  0x3a   : > { %274 = vst.msk [vmem:[#allocation2 + $0xc9] sm:$0xff] %vm170_vm0, %v241_v5 }
  0x3b   : > { %174 = vst.msk [vmem:[#allocation2 + $0x10] sm:$0x3] %vm173_vm1, %v1460_v0 }
  0x3c   : > { %177 = vst.msk [vmem:[#allocation2 + $0x28] sm:$0x3] %vm173_vm1, %v1460_v0 }
  0x3d   : > { %180 = vst.msk [vmem:[#allocation2 + $0x40] sm:$0x3] %vm173_vm1, %v1460_v0 }
  0x3e   : > { %183 = vst.msk [vmem:[#allocation2 + $0x58] sm:$0x3] %vm173_vm1, %v1460_v0 }
  0x3f   : > { %v1623_v6 = vld [vmem:[#allocation2 + $0xc0] sm:$0xff]  ;;  %186 = vst.msk [vmem:[#allocation2 + $0x70] sm:$0x3] %vm173_vm1, %v1460_v0 }
  0x40   : > { %355 = vxpose.xlu1.b32.start [1/16] (narrow) %v1623_v6, 8  ;;  %189 = vst.msk [vmem:[#allocation2 + $0x88] sm:$0x3] %vm173_vm1, %v1460_v0 }
  0x41   : > { %192 = vst.msk [vmem:[#allocation2 + $0xa0] sm:$0x3] %vm173_vm1, %v1460_v0  ;;  %v1638_v8 = vld [vmem:[#allocation2 + $0xc8] sm:$0xff] }
  0x42   : > { %195 = vst.msk [vmem:[#allocation2 + $0xb8] sm:$0x3] %vm173_vm1, %v1460_v0  ;;  %v390_v7 = vld [vmem:[#allocation2 + $0x9] sm:$0xff] }
  0x43   : > { %201 = vst.msk [vmem:[#allocation2 + $0xe8] sm:$0x3] %vm173_vm1, %v1460_v0  ;;  %422 = vxpose.xlu2.b32.cont [2/16] (narrow) %v390_v7, 8 }
  0x44   : > { %204 = vst.msk [vmem:[#allocation2 + $0x100] sm:$0x3] %vm173_vm1, %v1460_v0 }
  0x45   : > { %207 = vst.msk [vmem:[#allocation2 + $0x118] sm:$0x3] %vm173_vm1, %v1460_v0 }
  0x46   : > { %210 = vst.msk [vmem:[#allocation2 + $0x130] sm:$0x3] %vm173_vm1, %v1460_v0 }
  0x47   : > { %213 = vst.msk [vmem:[#allocation2 + $0x148] sm:$0x3] %vm173_vm1, %v1460_v0 }
  0x48   : > { %356 = vxpose.xlu1.b32.cont [2/16] (narrow) %v1638_v8, 8  ;;  %216 = vst.msk [vmem:[#allocation2 + $0x160] sm:$0x3] %vm173_vm1, %v1460_v0 }
  0x49   : > { %219 = vst.msk [vmem:[#allocation2 + $0x178] sm:$0x3] %vm173_vm1, %v1460_v0 }
  0x4a   : > { %222 = vst.msk [vmem:[#allocation2 + $0x190] sm:$0x3] %vm173_vm1, %v1460_v0 }
  0x4b   : > { %225 = vst.msk [vmem:[#allocation2 + $0x1a8] sm:$0x3] %vm173_vm1, %v1460_v0 }
  0x4c   : > { %259 = vst.msk [vmem:[#allocation2 + $0x19] sm:$0xff] %vm170_vm0, %v226_v9 }
  0x4d   : > { %275 = vst.msk [vmem:[#allocation2 + $0xd9] sm:$0xff] %vm170_vm0, %v242_v10 }
  0x4e   : > { %260 = vst.msk [vmem:[#allocation2 + $0x21] sm:$0xff] %vm170_vm0, %v227_v11 }
  0x4f   : > { %276 = vst.msk [vmem:[#allocation2 + $0xe1] sm:$0xff] %vm170_vm0, %v243_v12 }
  0x50   : > { %261 = vst.msk [vmem:[#allocation2 + $0x31] sm:$0xff] %vm170_vm0, %v228_v13 }
  0x51   : > { %277 = vst.msk [vmem:[#allocation2 + $0xf1] sm:$0xff] %vm170_vm0, %v244_v14 }
  0x52   : > { %262 = vst.msk [vmem:[#allocation2 + $0x39] sm:$0xff] %vm170_vm0, %v229_v15 }
  0x53   : > { %v1672_v19 = vld [vmem:[#allocation2 + $0x18] sm:$0xff]  ;;  %278 = vst.msk [vmem:[#allocation2 + $0xf9] sm:$0xff] %vm170_vm0, %v245_v16 }
  0x54   : > { %v1674_v20 = vld [vmem:[#allocation2 + $0x19] sm:$0xff]  ;;  %325 = vxpose.xlu0.b32.cont [3/16] (narrow) %v1672_v19, 8  ;;  %263 = vst.msk [vmem:[#allocation2 + $0x49] sm:$0xff] %vm170_vm0, %v230_v17  ;;  %v1837_v17 = vld [vmem:[#allocation2 + $0xc1] sm:$0xff] }
  0x55   : > { %v1679_v22 = vld [vmem:[#allocation2 + $0xd8] sm:$0xff]  ;;  %423 = vxpose.xlu2.b32.cont [3/16] (narrow) %v1674_v20, 8  ;;  %279 = vst.msk [vmem:[#allocation2 + $0x109] sm:$0xff] %vm170_vm0, %v246_v18  ;;  %v1686_v23 = vld [vmem:[#allocation2 + $0x20] sm:$0xff] }
  0x56   : > { %357 = vxpose.xlu1.b32.cont [3/16] (narrow) %v1679_v22, 8  ;;  %264 = vst.msk [vmem:[#allocation2 + $0x51] sm:$0xff] %vm170_vm0, %v231_v21  ;;  %v1688_v24 = vld [vmem:[#allocation2 + $0x21] sm:$0xff] }
  0x57   : > { %v1691_v26 = vld [vmem:[#allocation2 + $0xe0] sm:$0xff]  ;;  %280 = vst.msk [vmem:[#allocation2 + $0x111] sm:$0xff] %vm170_vm0, %v247_v25  ;;  %v1699_v28 = vld [vmem:[#allocation2 + $0x30] sm:$0xff] }
  0x58   : > { %265 = vst.msk [vmem:[#allocation2 + $0x61] sm:$0xff] %vm170_vm0, %v232_v27  ;;  %v1701_v29 = vld [vmem:[#allocation2 + $0x31] sm:$0xff]  ;;  %v1839_v18 = vld [vmem:[#allocation2 + $0xc2] sm:$0xff] }
  0x59   : > { %v1704_v31 = vld [vmem:[#allocation2 + $0xf0] sm:$0xff]  ;;  %281 = vst.msk [vmem:[#allocation2 + $0x121] sm:$0xff] %vm170_vm0, %v248_v30  ;;  %v1712_v33 = vld [vmem:[#allocation2 + $0x38] sm:$0xff]  ;;  %v493_v21 = vld [vmem:[#allocation2 + $0x2] sm:$0xff] }
  0x5a   : > { %266 = vst.msk [vmem:[#allocation2 + $0x69] sm:$0xff] %vm170_vm0, %v233_v32  ;;  %v1714_v34 = vld [vmem:[#allocation2 + $0x39] sm:$0xff]  ;;  %v1843_v25 = vld [vmem:[#allocation2 + $0xc9] sm:$0xff] }
  0x5b   : > { %v1717_v36 = vld [vmem:[#allocation2 + $0xf8] sm:$0xff]  ;;  %282 = vst.msk [vmem:[#allocation2 + $0x129] sm:$0xff] %vm170_vm0, %v249_v35  ;;  %v1725_v38 = vld [vmem:[#allocation2 + $0x48] sm:$0xff] }
  0x5c   : > { %326 = vxpose.xlu0.b32.cont [4/16] (narrow) %v1686_v23, 8  ;;  %267 = vst.msk [vmem:[#allocation2 + $0x79] sm:$0xff] %vm170_vm0, %v234_v37  ;;  %v1727_v39 = vld [vmem:[#allocation2 + $0x49] sm:$0xff]  ;;  %v1849_v32 = vld [vmem:[#allocation2 + $0xd9] sm:$0xff] }
  0x5d   : > { %424 = vxpose.xlu2.b32.cont [4/16] (narrow) %v1688_v24, 8  ;;  %v1730_v41 = vld [vmem:[#allocation2 + $0x108] sm:$0xff]  ;;  %283 = vst.msk [vmem:[#allocation2 + $0x139] sm:$0xff] %vm170_vm0, %v250_v40  ;;  %v1738_v43 = vld [vmem:[#allocation2 + $0x50] sm:$0xff]  ;;  %v1851_v35 = vld [vmem:[#allocation2 + $0xda] sm:$0xff] }
  0x5e   : > { %358 = vxpose.xlu1.b32.cont [4/16] (narrow) %v1691_v26, 8  ;;  %268 = vst.msk [vmem:[#allocation2 + $0x81] sm:$0xff] %vm170_vm0, %v235_v42  ;;  %v1740_v44 = vld [vmem:[#allocation2 + $0x51] sm:$0xff]  ;;  %v1853_v37 = vld [vmem:[#allocation2 + $0x1a] sm:$0xff]  ;;  %v1860_v42 = vld [vmem:[#allocation2 + $0xe2] sm:$0xff] }
  0x5f   : > { %v1743_v46 = vld [vmem:[#allocation2 + $0x110] sm:$0xff]  ;;  %284 = vst.msk [vmem:[#allocation2 + $0x141] sm:$0xff] %vm170_vm0, %v251_v45  ;;  %v1751_v48 = vld [vmem:[#allocation2 + $0x60] sm:$0xff] }
  0x60   : > { %269 = vst.msk [vmem:[#allocation2 + $0x91] sm:$0xff] %vm170_vm0, %v236_v47  ;;  %v1753_v49 = vld [vmem:[#allocation2 + $0x61] sm:$0xff]  ;;  %v1845_v27 = vld [vmem:[#allocation2 + $0xca] sm:$0xff] }
  0x61   : > { %v1756_v51 = vld [vmem:[#allocation2 + $0x120] sm:$0xff]  ;;  %285 = vst.msk [vmem:[#allocation2 + $0x151] sm:$0xff] %vm170_vm0, %v252_v50  ;;  %v1764_v53 = vld [vmem:[#allocation2 + $0x68] sm:$0xff]  ;;  %v1867_v47 = vld [vmem:[#allocation2 + $0xf1] sm:$0xff] }
  0x62   : > { %270 = vst.msk [vmem:[#allocation2 + $0x99] sm:$0xff] %vm170_vm0, %v237_v52  ;;  %v1766_v54 = vld [vmem:[#allocation2 + $0x69] sm:$0xff]  ;;  %v1858_v40 = vld [vmem:[#allocation2 + $0xe1] sm:$0xff]  ;;  %v1869_v50 = vld [vmem:[#allocation2 + $0xf2] sm:$0xff] }
  0x63   : > { %v1769_v56 = vld [vmem:[#allocation2 + $0x128] sm:$0xff]  ;;  %286 = vst.msk [vmem:[#allocation2 + $0x159] sm:$0xff] %vm170_vm0, %v253_v55  ;;  %v1777_v58 = vld [vmem:[#allocation2 + $0x78] sm:$0xff] }
  0x64   : > { %327 = vxpose.xlu0.b32.cont [5/16] (narrow) %v1699_v28, 8  ;;  %271 = vst.msk [vmem:[#allocation2 + $0xa9] sm:$0xff] %vm170_vm0, %v238_v57  ;;  %v1779_v59 = vld [vmem:[#allocation2 + $0x79] sm:$0xff]  ;;  %v494_v30 = vld [vmem:[#allocation2 + $0xa] sm:$0xff]  ;;  %v1862_v45 = vld [vmem:[#allocation2 + $0x22] sm:$0xff] }
  0x65   : > { %425 = vxpose.xlu2.b32.cont [5/16] (narrow) %v1701_v29, 8  ;;  %v1782_v61 = vld [vmem:[#allocation2 + $0x138] sm:$0xff]  ;;  %287 = vst.msk [vmem:[#allocation2 + $0x169] sm:$0xff] %vm170_vm0, %v254_v60  ;;  %v1790_v63 = vld [vmem:[#allocation2 + $0x80] sm:$0xff] }
  0x66   : > { %359 = vxpose.xlu1.b32.cont [5/16] (narrow) %v1704_v31, 8  ;;  %272 = vst.msk [vmem:[#allocation2 + $0xb1] sm:$0xff] %vm170_vm0, %v239_v62  ;;  %v1792_v0 = vld [vmem:[#allocation2 + $0x81] sm:$0xff]  ;;  %v1871_v52 = vld [vmem:[#allocation2 + $0x32] sm:$0xff]  ;;  %v1885_v62 = vld [vmem:[#allocation2 + $0x109] sm:$0xff] }
  0x67   : > { %v1795_v2 = vld [vmem:[#allocation2 + $0x140] sm:$0xff]  ;;  %288 = vst.msk [vmem:[#allocation2 + $0x171] sm:$0xff] %vm170_vm0, %v255_v1  ;;  %v1801_v3 = vld [vmem:[#allocation2 + $0x90] sm:$0xff] }
  0x68   : > { %v1803_v4 = vld [vmem:[#allocation2 + $0x91] sm:$0xff]  ;;  %2282 = vst [vmem:[#allocation7_spill] sm:$0xff] %v1839_v18  ;;  %v1876_v55 = vld [vmem:[#allocation2 + $0xf9] sm:$0xff] }
  0x69   : > { %v1805_v5 = vld [vmem:[#allocation2 + $0x150] sm:$0xff]  ;;  %v1810_v7 = vld [vmem:[#allocation2 + $0x98] sm:$0xff]  ;;  %2283 = vst [vmem:[#allocation8_spill] sm:$0xff] %v1845_v27 }
  0x6a   : > { %v1812_v9 = vld [vmem:[#allocation2 + $0x99] sm:$0xff]  ;;  %2284 = vst [vmem:[#allocation9_spill] sm:$0xff] %v1851_v35  ;;  %v1887_v1 = vld [vmem:[#allocation2 + $0x10a] sm:$0xff] }
  0x6b   : > { %v1814_v10 = vld [vmem:[#allocation2 + $0x158] sm:$0xff]  ;;  %v1819_v11 = vld [vmem:[#allocation2 + $0xa8] sm:$0xff]  ;;  %2285 = vst [vmem:[#allocation10_spill] sm:$0xff] %v1860_v42 }
  0x6c   : > { %328 = vxpose.xlu0.b32.cont [6/16] (narrow) %v1712_v33, 8  ;;  %v1821_v12 = vld [vmem:[#allocation2 + $0xa9] sm:$0xff]  ;;  %2286 = vst [vmem:[#allocation11_spill] sm:$0xff] %v1869_v50  ;;  %v1878_v57 = vld [vmem:[#allocation2 + $0xfa] sm:$0xff] }
  0x6d   : > { %426 = vxpose.xlu2.b32.cont [6/16] (narrow) %v1714_v34, 8  ;;  %v1823_v13 = vld [vmem:[#allocation2 + $0x168] sm:$0xff]  ;;  %v1828_v14 = vld [vmem:[#allocation2 + $0xb0] sm:$0xff]  ;;  %2287 = vst [vmem:[#allocation12_spill] sm:$0xff] %v1871_v52  ;;  %v1880_v60 = vld [vmem:[#allocation2 + $0x3a] sm:$0xff] }
  0x6e   : > { %360 = vxpose.xlu1.b32.cont [6/16] (narrow) %v1717_v36, 8  ;;  %v1830_v15 = vld [vmem:[#allocation2 + $0xb1] sm:$0xff]  ;;  %2288 = vst [vmem:[#allocation13_spill] sm:$0xff] %v1876_v55 }
  0x6f   : > { %v1832_v16 = vld [vmem:[#allocation2 + $0x170] sm:$0xff]  ;;  %2289 = vst [vmem:[#allocation14_spill] sm:$0xff] %v1878_v57 }
  0x70   : > { %2290 = vst [vmem:[#allocation15_spill] sm:$0xff] %v1880_v60 }
  0x71   : > { %2291 = vst [vmem:[#allocation16_spill] sm:$0xff] %v1885_v62 }
  0x72   : > { %2292 = vst [vmem:[#allocation17_spill] sm:$0xff] %v1887_v1 }
  0x74   : > { %329 = vxpose.xlu0.b32.cont [7/16] (narrow) %v1725_v38, 8 }
  0x75   : > { %427 = vxpose.xlu2.b32.cont [7/16] (narrow) %v1727_v39, 8 }
  0x76   : > { %361 = vxpose.xlu1.b32.cont [7/16] (narrow) %v1730_v41, 8 }
  0x7c   : > { %330 = vxpose.xlu0.b32.cont [8/16] (narrow) %v1738_v43, 8 }
  0x7d   : > { %428 = vxpose.xlu2.b32.cont [8/16] (narrow) %v1740_v44, 8 }
  0x7e   : > { %362 = vxpose.xlu1.b32.cont [8/16] (narrow) %v1743_v46, 8 }
  0x84   : > { %331 = vxpose.xlu0.b32.cont [9/16] (narrow) %v1751_v48, 8 }
  0x85   : > { %429 = vxpose.xlu2.b32.cont [9/16] (narrow) %v1753_v49, 8 }
  0x86   : > { %363 = vxpose.xlu1.b32.cont [9/16] (narrow) %v1756_v51, 8 }
  0x8c   : > { %332 = vxpose.xlu0.b32.cont [10/16] (narrow) %v1764_v53, 8 }
  0x8d   : > { %430 = vxpose.xlu2.b32.cont [10/16] (narrow) %v1766_v54, 8 }
  0x8e   : > { %364 = vxpose.xlu1.b32.cont [10/16] (narrow) %v1769_v56, 8 }
  0x94   : > { %333 = vxpose.xlu0.b32.cont [11/16] (narrow) %v1777_v58, 8 }
  0x95   : > { %431 = vxpose.xlu2.b32.cont [11/16] (narrow) %v1779_v59, 8 }
  0x96   : > { %365 = vxpose.xlu1.b32.cont [11/16] (narrow) %v1782_v61, 8 }
  0x9c   : > { %334 = vxpose.xlu0.b32.cont [12/16] (narrow) %v1790_v63, 8 }
  0x9d   : > { %432 = vxpose.xlu2.b32.cont [12/16] (narrow) %v1792_v0, 8 }
  0x9e   : > { %366 = vxpose.xlu1.b32.cont [12/16] (narrow) %v1795_v2, 8 }
  0xa4   : > { %335 = vxpose.xlu0.b32.cont [13/16] (narrow) %v1801_v3, 8 }
  0xa5   : > { %433 = vxpose.xlu2.b32.cont [13/16] (narrow) %v1803_v4, 8 }
  0xa6   : > { %367 = vxpose.xlu1.b32.cont [13/16] (narrow) %v1805_v5, 8 }
  0xac   : > { %336 = vxpose.xlu0.b32.cont [14/16] (narrow) %v1810_v7, 8 }
  0xad   : > { %434 = vxpose.xlu2.b32.cont [14/16] (narrow) %v1812_v9, 8 }
  0xae   : > { %368 = vxpose.xlu1.b32.cont [14/16] (narrow) %v1814_v10, 8 }
  0xb4   : > { %337 = vxpose.xlu0.b32.cont [15/16] (narrow) %v1819_v11, 8 }
  0xb5   : > { %435 = vxpose.xlu2.b32.cont [15/16] (narrow) %v1821_v12, 8 }
  0xb6   : > { %369 = vxpose.xlu1.b32.cont [15/16] (narrow) %v1823_v13, 8 }
  0xbc   : > { %338 = vxpose.xlu0.b32.end [16/16] (narrow) %v1828_v14, 8 }
  0xbd   : > { %436 = vxpose.xlu2.b32.end [16/16] (narrow) %v1830_v15, 8 }
  0xbe   : > { %370 = vxpose.xlu1.b32.end [16/16] (narrow) %v1832_v16, 8 }
  0xc4   : > { %453 = vxpose.xlu0.b32.start [1/16] (narrow) %v1837_v17, 8 }
  0xc5   : > { %557 = vxpose.xlu2.b32.start [1/16] (narrow) %v1839_v18, 8  ;;  %v1898_v18 = vld [vmem:[#allocation2 + $0x52] sm:$0xff] }
  0xc6   : > { %525 = vxpose.xlu1.b32.start [1/16] (narrow) %v493_v21, 8  ;;  %v1889_v21 = vld [vmem:[#allocation2 + $0x4a] sm:$0xff]  ;;  %2296 = vst [vmem:[#allocation21_spill] sm:$0xff] %v1898_v18 }
  0xc7   : > { %2293 = vst [vmem:[#allocation18_spill] sm:$0xff] %v1889_v21 }
  0xcc   : > { %454 = vxpose.xlu0.b32.cont [2/16] (narrow) %v1843_v25, 8 }
  0xcd   : > { %558 = vxpose.xlu2.b32.cont [2/16] (narrow) %v1845_v27, 8  ;;  %v1896_v27 = vld [vmem:[#allocation2 + $0x112] sm:$0xff] }
  0xce   : > { %526 = vxpose.xlu1.b32.cont [2/16] (narrow) %v494_v30, 8  ;;  %v1894_v30 = vld [vmem:[#allocation2 + $0x111] sm:$0xff]  ;;  %2295 = vst [vmem:[#allocation20_spill] sm:$0xff] %v1896_v27 }
  0xcf   : > { %2294 = vst [vmem:[#allocation19_spill] sm:$0xff] %v1894_v30 }
  0xd4   : > { %455 = vxpose.xlu0.b32.cont [3/16] (narrow) %v1849_v32, 8 }
  0xd5   : > { %559 = vxpose.xlu2.b32.cont [3/16] (narrow) %v1851_v35, 8 }
  0xd6   : > { %527 = vxpose.xlu1.b32.cont [3/16] (narrow) %v1853_v37, 8 }
  0xdc   : > { %456 = vxpose.xlu0.b32.cont [4/16] (narrow) %v1858_v40, 8 }
  0xdd   : > { %560 = vxpose.xlu2.b32.cont [4/16] (narrow) %v1860_v42, 8 }
  0xde   : > { %528 = vxpose.xlu1.b32.cont [4/16] (narrow) %v1862_v45, 8 }
  0xe4   : > { %457 = vxpose.xlu0.b32.cont [5/16] (narrow) %v1867_v47, 8 }
  0xe5   : > { %561 = vxpose.xlu2.b32.cont [5/16] (narrow) %v1869_v50, 8 }
  0xe6   : > { %529 = vxpose.xlu1.b32.cont [5/16] (narrow) %v1871_v52, 8 }
  0xec   : > { %458 = vxpose.xlu0.b32.cont [6/16] (narrow) %v1876_v55, 8 }
  0xed   : > { %562 = vxpose.xlu2.b32.cont [6/16] (narrow) %v1878_v57, 8  ;;  %v1905_v57 = vld [vmem:[#allocation2 + $0x122] sm:$0xff] }
  0xee   : > { %530 = vxpose.xlu1.b32.cont [6/16] (narrow) %v1880_v60, 8  ;;  %v1903_v60 = vld [vmem:[#allocation2 + $0x121] sm:$0xff]  ;;  %2298 = vst [vmem:[#allocation23_spill] sm:$0xff] %v1905_v57 }
  0xef   : > { %2297 = vst [vmem:[#allocation22_spill] sm:$0xff] %v1903_v60 }
  0xf4   : > { %459 = vxpose.xlu0.b32.cont [7/16] (narrow) %v1885_v62, 8  ;;  %v1907_v62 = vld [vmem:[#allocation2 + $0x62] sm:$0xff] }
  0xf5   : > { %563 = vxpose.xlu2.b32.cont [7/16] (narrow) %v1887_v1, 8  ;;  %2299 = vst [vmem:[#allocation24_spill] sm:$0xff] %v1907_v62  ;;  %v1914_v1 = vld [vmem:[#allocation2 + $0x12a] sm:$0xff] }
  0xf6   : > { %531 = vxpose.xlu1.b32.cont [7/16] (narrow) %v1889_v21, 8  ;;  %v1912_v21 = vld [vmem:[#allocation2 + $0x129] sm:$0xff]  ;;  %2301 = vst [vmem:[#allocation26_spill] sm:$0xff] %v1914_v1 }
  0xf7   : > { %2300 = vst [vmem:[#allocation25_spill] sm:$0xff] %v1912_v21 }
  0xfc   : > { %460 = vxpose.xlu0.b32.cont [8/16] (narrow) %v1894_v30, 8  ;;  %v1916_v30 = vld [vmem:[#allocation2 + $0x6a] sm:$0xff] }
  0xfd   : > { %564 = vxpose.xlu2.b32.cont [8/16] (narrow) %v1896_v27, 8  ;;  %2302 = vst [vmem:[#allocation27_spill] sm:$0xff] %v1916_v30  ;;  %v1923_v27 = vld [vmem:[#allocation2 + $0x13a] sm:$0xff] }
  0xfe   : > { %532 = vxpose.xlu1.b32.cont [8/16] (narrow) %v1898_v18, 8  ;;  %v1921_v18 = vld [vmem:[#allocation2 + $0x139] sm:$0xff]  ;;  %2304 = vst [vmem:[#allocation29_spill] sm:$0xff] %v1923_v27 }
  0xff   : > { %2303 = vst [vmem:[#allocation28_spill] sm:$0xff] %v1921_v18 }
 0x104   : > { %461 = vxpose.xlu0.b32.cont [9/16] (narrow) %v1903_v60, 8  ;;  %v1925_v60 = vld [vmem:[#allocation2 + $0x7a] sm:$0xff] }
 0x105   : > { %565 = vxpose.xlu2.b32.cont [9/16] (narrow) %v1905_v57, 8  ;;  %2305 = vst [vmem:[#allocation30_spill] sm:$0xff] %v1925_v60  ;;  %v1932_v57 = vld [vmem:[#allocation2 + $0x142] sm:$0xff] }
 0x106   : > { %533 = vxpose.xlu1.b32.cont [9/16] (narrow) %v1907_v62, 8  ;;  %v1930_v62 = vld [vmem:[#allocation2 + $0x141] sm:$0xff]  ;;  %2307 = vst [vmem:[#allocation32_spill] sm:$0xff] %v1932_v57 }
 0x107   : > { %2306 = vst [vmem:[#allocation31_spill] sm:$0xff] %v1930_v62 }
 0x10c   : > { %462 = vxpose.xlu0.b32.cont [10/16] (narrow) %v1912_v21, 8  ;;  %v1934_v21 = vld [vmem:[#allocation2 + $0x82] sm:$0xff] }
 0x10d   : > { %566 = vxpose.xlu2.b32.cont [10/16] (narrow) %v1914_v1, 8  ;;  %2308 = vst [vmem:[#allocation33_spill] sm:$0xff] %v1934_v21  ;;  %v1941_v1 = vld [vmem:[#allocation2 + $0x152] sm:$0xff] }
 0x10e   : > { %534 = vxpose.xlu1.b32.cont [10/16] (narrow) %v1916_v30, 8  ;;  %v1939_v30 = vld [vmem:[#allocation2 + $0x151] sm:$0xff]  ;;  %2310 = vst [vmem:[#allocation35_spill] sm:$0xff] %v1941_v1 }
 0x10f   : > { %2309 = vst [vmem:[#allocation34_spill] sm:$0xff] %v1939_v30 }
 0x114   : > { %463 = vxpose.xlu0.b32.cont [11/16] (narrow) %v1921_v18, 8  ;;  %v1943_v18 = vld [vmem:[#allocation2 + $0x92] sm:$0xff] }
 0x115   : > { %567 = vxpose.xlu2.b32.cont [11/16] (narrow) %v1923_v27, 8  ;;  %2311 = vst [vmem:[#allocation36_spill] sm:$0xff] %v1943_v18  ;;  %v1950_v27 = vld [vmem:[#allocation2 + $0x15a] sm:$0xff] }
 0x116   : > { %535 = vxpose.xlu1.b32.cont [11/16] (narrow) %v1925_v60, 8  ;;  %v1948_v60 = vld [vmem:[#allocation2 + $0x159] sm:$0xff] }
 0x117   : > { %2312 = vst [vmem:[#allocation37_spill] sm:$0xff] %v1948_v60 }
 0x11c   : > { %464 = vxpose.xlu0.b32.cont [12/16] (narrow) %v1930_v62, 8  ;;  %v1952_v62 = vld [vmem:[#allocation2 + $0x9a] sm:$0xff] }
 0x11d   : > { %568 = vxpose.xlu2.b32.cont [12/16] (narrow) %v1932_v57, 8  ;;  %2313 = vst [vmem:[#allocation38_spill] sm:$0xff] %v1952_v62  ;;  %v1959_v57 = vld [vmem:[#allocation2 + $0x16a] sm:$0xff] }
 0x11e   : > { %536 = vxpose.xlu1.b32.cont [12/16] (narrow) %v1934_v21, 8  ;;  %v1957_v21 = vld [vmem:[#allocation2 + $0x169] sm:$0xff]  ;;  %2315 = vst [vmem:[#allocation40_spill] sm:$0xff] %v1959_v57 }
 0x11f   : > { %2314 = vst [vmem:[#allocation39_spill] sm:$0xff] %v1957_v21 }
 0x124   : > { %465 = vxpose.xlu0.b32.cont [13/16] (narrow) %v1939_v30, 8  ;;  %v1961_v30 = vld [vmem:[#allocation2 + $0xaa] sm:$0xff] }
 0x125   : > { %569 = vxpose.xlu2.b32.cont [13/16] (narrow) %v1941_v1, 8  ;;  %v1968_v1 = vld [vmem:[#allocation2 + $0x172] sm:$0xff] }
 0x126   : > { %537 = vxpose.xlu1.b32.cont [13/16] (narrow) %v1943_v18, 8  ;;  %v1966_v18 = vld [vmem:[#allocation2 + $0x171] sm:$0xff]  ;;  %2316 = vst [vmem:[#allocation41_spill] sm:$0xff] %v1968_v1 }
 0x12c   : > { %466 = vxpose.xlu0.b32.cont [14/16] (narrow) %v1948_v60, 8  ;;  %v1970_v60 = vld [vmem:[#allocation2 + $0xb2] sm:$0xff] }
 0x12d   : > { %570 = vxpose.xlu2.b32.cont [14/16] (narrow) %v1950_v27, 8 }
 0x12e   : > { %538 = vxpose.xlu1.b32.cont [14/16] (narrow) %v1952_v62, 8 }
 0x134   : > { %467 = vxpose.xlu0.b32.cont [15/16] (narrow) %v1957_v21, 8 }
 0x135   : > { %571 = vxpose.xlu2.b32.cont [15/16] (narrow) %v1959_v57, 8 }
 0x136   : > { %539 = vxpose.xlu1.b32.cont [15/16] (narrow) %v1961_v30, 8 }
 0x13c   : > { %468 = vxpose.xlu0.b32.end [16/16] (narrow) %v1966_v18, 8 }
 0x13d   : > { %572 = vxpose.xlu2.b32.end [16/16] (narrow) %v1968_v1, 8 }
 0x13e   : > { %540 = vxpose.xlu1.b32.end [16/16] (narrow) %v1970_v60, 8 }
 0x144   : > { %623 = vxpose.xlu0.b32.start [1/16] (narrow) %v1672_v19, 8  ;;  %v256_v19 = vld [vmem:[%s1597_s28 + $0xf0] sm:$0xff] }
 0x145   : > { %727 = vxpose.xlu2.b32.start [1/16] (narrow) %v1674_v20, 8  ;;  %289 = vst.msk [vmem:[#allocation2 + $0x181] sm:$0xff] %vm170_vm0, %v256_v19  ;;  %v257_v20 = vld [vmem:[%s1597_s28 + $0xf8] sm:$0xff]  ;;  %v2319_v19 = vld [vmem:[#allocation16_spill] sm:$0xff]  ;;  %s1416_s28 = scalar_lea.hbm %s2218_s3, 32 }
 0x146   : > { %655 = vxpose.xlu1.b32.start [1/16] (narrow) %v1679_v22, 8  ;;  %290 = vst.msk [vmem:[#allocation2 + $0x189] sm:$0xff] %vm170_vm0, %v257_v20  ;;  %v2321_v20 = vld [vmem:[#allocation18_spill] sm:$0xff]  ;;  %p1418_p1 = scmp.lt.s32.totalorder %s1416_s28, %s1412_s16 }
 0x148   : > { %p1419_p2 = por %p1418_p1, %p1417_p0 }
 0x14a   : > { %p1420_p3 = pnand %p1419_p2, %p1415_p13 }
 0x14c   : > { %624 = vxpose.xlu0.b32.cont [2/16] (narrow) %v1686_v23, 8  ;;  %v2021_v23 = vld [vmem:[#allocation2 + $0x180] sm:$0xff] }
 0x14d   : > { %728 = vxpose.xlu2.b32.cont [2/16] (narrow) %v1688_v24, 8  ;;  %v2026_v24 = vld [vmem:[#allocation2 + $0x188] sm:$0xff] }
 0x14e   : > { %656 = vxpose.xlu1.b32.cont [2/16] (narrow) %v1691_v26, 8 }
 0x154   : > { %625 = vxpose.xlu0.b32.cont [3/16] (narrow) %v1699_v28, 8 }
 0x155   : > { %729 = vxpose.xlu2.b32.cont [3/16] (narrow) %v1701_v29, 8 }
 0x156   : > { %657 = vxpose.xlu1.b32.cont [3/16] (narrow) %v1704_v31, 8 }
 0x15c   : > { %626 = vxpose.xlu0.b32.cont [4/16] (narrow) %v1712_v33, 8 }
 0x15d   : > { %730 = vxpose.xlu2.b32.cont [4/16] (narrow) %v1714_v34, 8 }
 0x15e   : > { %658 = vxpose.xlu1.b32.cont [4/16] (narrow) %v1717_v36, 8 }
 0x164   : > { %627 = vxpose.xlu0.b32.cont [5/16] (narrow) %v1725_v38, 8 }
 0x165   : > { %731 = vxpose.xlu2.b32.cont [5/16] (narrow) %v1727_v39, 8 }
 0x166   : > { %659 = vxpose.xlu1.b32.cont [5/16] (narrow) %v1730_v41, 8 }
 0x16c   : > { %628 = vxpose.xlu0.b32.cont [6/16] (narrow) %v1738_v43, 8 }
 0x16d   : > { %732 = vxpose.xlu2.b32.cont [6/16] (narrow) %v1740_v44, 8 }
 0x16e   : > { %660 = vxpose.xlu1.b32.cont [6/16] (narrow) %v1743_v46, 8 }
 0x174   : > { %629 = vxpose.xlu0.b32.cont [7/16] (narrow) %v1751_v48, 8 }
 0x175   : > { %733 = vxpose.xlu2.b32.cont [7/16] (narrow) %v1753_v49, 8 }
 0x176   : > { %661 = vxpose.xlu1.b32.cont [7/16] (narrow) %v1756_v51, 8 }
 0x17c   : > { %630 = vxpose.xlu0.b32.cont [8/16] (narrow) %v1764_v53, 8 }
 0x17d   : > { %734 = vxpose.xlu2.b32.cont [8/16] (narrow) %v1766_v54, 8 }
 0x17e   : > { %662 = vxpose.xlu1.b32.cont [8/16] (narrow) %v1769_v56, 8 }
 0x184   : > { %631 = vxpose.xlu0.b32.cont [9/16] (narrow) %v1777_v58, 8 }
 0x185   : > { %735 = vxpose.xlu2.b32.cont [9/16] (narrow) %v1779_v59, 8 }
 0x186   : > { %663 = vxpose.xlu1.b32.cont [9/16] (narrow) %v1782_v61, 8 }
 0x18c   : > { %632 = vxpose.xlu0.b32.cont [10/16] (narrow) %v1790_v63, 8 }
 0x18d   : > { %736 = vxpose.xlu2.b32.cont [10/16] (narrow) %v1792_v0, 8 }
 0x18e   : > { %664 = vxpose.xlu1.b32.cont [10/16] (narrow) %v1795_v2, 8 }
 0x194   : > { %633 = vxpose.xlu0.b32.cont [11/16] (narrow) %v1801_v3, 8 }
 0x195   : > { %737 = vxpose.xlu2.b32.cont [11/16] (narrow) %v1803_v4, 8 }
 0x196   : > { %665 = vxpose.xlu1.b32.cont [11/16] (narrow) %v1805_v5, 8 }
 0x19c   : > { %634 = vxpose.xlu0.b32.cont [12/16] (narrow) %v1810_v7, 8 }
 0x19d   : > { %738 = vxpose.xlu2.b32.cont [12/16] (narrow) %v1812_v9, 8 }
 0x19e   : > { %666 = vxpose.xlu1.b32.cont [12/16] (narrow) %v1814_v10, 8 }
 0x1a4   : > { %635 = vxpose.xlu0.b32.cont [13/16] (narrow) %v1819_v11, 8 }
 0x1a5   : > { %739 = vxpose.xlu2.b32.cont [13/16] (narrow) %v1821_v12, 8 }
 0x1a6   : > { %667 = vxpose.xlu1.b32.cont [13/16] (narrow) %v1823_v13, 8 }
 0x1ac   : > { %636 = vxpose.xlu0.b32.cont [14/16] (narrow) %v1828_v14, 8 }
 0x1ad   : > { %740 = vxpose.xlu2.b32.cont [14/16] (narrow) %v1830_v15, 8 }
 0x1ae   : > { %668 = vxpose.xlu1.b32.cont [14/16] (narrow) %v1832_v16, 8 }
 0x1b4   : > { %637 = vxpose.xlu0.b32.cont [15/16] (narrow) %v1623_v6, 8  ;;  %v2317_v6 = vld [vmem:[#allocation14_spill] sm:$0xff] }
 0x1b5   : > { %741 = vxpose.xlu2.b32.cont [15/16] (narrow) %v1837_v17, 8 }
 0x1b6   : > { %669 = vxpose.xlu1.b32.cont [15/16] (narrow) %v2021_v23, 8 }
 0x1bc   : > { %638 = vxpose.xlu0.b32.end [16/16] (narrow) %v1638_v8, 8  ;;  %v2318_v8 = vld [vmem:[#allocation15_spill] sm:$0xff] }
 0x1bd   : > { %742 = vxpose.xlu2.b32.end [16/16] (narrow) %v1843_v25, 8 }
 0x1be   : > { %670 = vxpose.xlu1.b32.end [16/16] (narrow) %v2026_v24, 8 }
 0x1c4   : > { %759 = vxpose.xlu0.b32.start [1/16] (narrow) %v1849_v32, 8 }
 0x1c5   : > { %857 = vxpose.xlu2.b32.start [1/16] (narrow) %v1851_v35, 8  ;;  %v2324_v35 = vld [vmem:[#allocation21_spill] sm:$0xff] }
 0x1c6   : > { %825 = vxpose.xlu1.b32.start [1/16] (narrow) %v1853_v37, 8  ;;  %v2320_v37 = vld [vmem:[#allocation17_spill] sm:$0xff] }
 0x1cc   : > { %760 = vxpose.xlu0.b32.cont [2/16] (narrow) %v1858_v40, 8 }
 0x1cd   : > { %858 = vxpose.xlu2.b32.cont [2/16] (narrow) %v1860_v42, 8  ;;  %v2322_v42 = vld [vmem:[#allocation19_spill] sm:$0xff] }
 0x1ce   : > { %826 = vxpose.xlu1.b32.cont [2/16] (narrow) %v1862_v45, 8  ;;  %v2323_v45 = vld [vmem:[#allocation20_spill] sm:$0xff] }
 0x1d4   : > { %761 = vxpose.xlu0.b32.cont [3/16] (narrow) %v1867_v47, 8 }
 0x1d5   : > { %859 = vxpose.xlu2.b32.cont [3/16] (narrow) %v1869_v50, 8  ;;  %v2325_v50 = vld [vmem:[#allocation22_spill] sm:$0xff] }
 0x1d6   : > { %827 = vxpose.xlu1.b32.cont [3/16] (narrow) %v1871_v52, 8  ;;  %v2326_v52 = vld [vmem:[#allocation23_spill] sm:$0xff] }
 0x1dc   : > { %762 = vxpose.xlu0.b32.cont [4/16] (narrow) %v1876_v55, 8  ;;  %v2327_v55 = vld [vmem:[#allocation24_spill] sm:$0xff] }
 0x1dd   : > { %860 = vxpose.xlu2.b32.cont [4/16] (narrow) %v2317_v6, 8  ;;  %v2328_v6 = vld [vmem:[#allocation25_spill] sm:$0xff] }
 0x1de   : > { %828 = vxpose.xlu1.b32.cont [4/16] (narrow) %v2318_v8, 8  ;;  %v2329_v8 = vld [vmem:[#allocation26_spill] sm:$0xff] }
 0x1e4   : > { %763 = vxpose.xlu0.b32.cont [5/16] (narrow) %v2319_v19, 8  ;;  %v2330_v19 = vld [vmem:[#allocation27_spill] sm:$0xff] }
 0x1e5   : > { %861 = vxpose.xlu2.b32.cont [5/16] (narrow) %v2320_v37, 8  ;;  %v2331_v37 = vld [vmem:[#allocation28_spill] sm:$0xff] }
 0x1e6   : > { %829 = vxpose.xlu1.b32.cont [5/16] (narrow) %v2321_v20, 8  ;;  %v2332_v20 = vld [vmem:[#allocation29_spill] sm:$0xff] }
 0x1ec   : > { %764 = vxpose.xlu0.b32.cont [6/16] (narrow) %v2322_v42, 8  ;;  %v2333_v42 = vld [vmem:[#allocation30_spill] sm:$0xff] }
 0x1ed   : > { %862 = vxpose.xlu2.b32.cont [6/16] (narrow) %v2323_v45, 8  ;;  %v2334_v45 = vld [vmem:[#allocation31_spill] sm:$0xff] }
 0x1ee   : > { %830 = vxpose.xlu1.b32.cont [6/16] (narrow) %v2324_v35, 8  ;;  %v2335_v35 = vld [vmem:[#allocation32_spill] sm:$0xff] }
 0x1f4   : > { %765 = vxpose.xlu0.b32.cont [7/16] (narrow) %v2325_v50, 8  ;;  %v2336_v50 = vld [vmem:[#allocation33_spill] sm:$0xff] }
 0x1f5   : > { %863 = vxpose.xlu2.b32.cont [7/16] (narrow) %v2326_v52, 8  ;;  %v2337_v52 = vld [vmem:[#allocation34_spill] sm:$0xff] }
 0x1f6   : > { %831 = vxpose.xlu1.b32.cont [7/16] (narrow) %v2327_v55, 8  ;;  %v2338_v55 = vld [vmem:[#allocation35_spill] sm:$0xff] }
 0x1fc   : > { %766 = vxpose.xlu0.b32.cont [8/16] (narrow) %v2328_v6, 8  ;;  %v2339_v6 = vld [vmem:[#allocation36_spill] sm:$0xff] }
 0x1fd   : > { %864 = vxpose.xlu2.b32.cont [8/16] (narrow) %v2329_v8, 8  ;;  %v2340_v8 = vld [vmem:[#allocation37_spill] sm:$0xff] }
 0x1fe   : > { %832 = vxpose.xlu1.b32.cont [8/16] (narrow) %v2330_v19, 8 }
 0x204   : > { %767 = vxpose.xlu0.b32.cont [9/16] (narrow) %v2331_v37, 8 }
 0x205   : > { %865 = vxpose.xlu2.b32.cont [9/16] (narrow) %v2332_v20, 8 }
 0x206   : > { %833 = vxpose.xlu1.b32.cont [9/16] (narrow) %v2333_v42, 8 }
 0x20c   : > { %768 = vxpose.xlu0.b32.cont [10/16] (narrow) %v2334_v45, 8 }
 0x20d   : > { %866 = vxpose.xlu2.b32.cont [10/16] (narrow) %v2335_v35, 8 }
 0x20e   : > { %834 = vxpose.xlu1.b32.cont [10/16] (narrow) %v2336_v50, 8 }
 0x214   : > { %769 = vxpose.xlu0.b32.cont [11/16] (narrow) %v2337_v52, 8 }
 0x215   : > { %867 = vxpose.xlu2.b32.cont [11/16] (narrow) %v2338_v55, 8  ;;  %v2073_v55 = vld [vmem:[#allocation2 + $0x181] sm:$0xff] }
 0x216   : > { %835 = vxpose.xlu1.b32.cont [11/16] (narrow) %v2339_v6, 8  ;;  %v2075_v6 = vld [vmem:[#allocation2 + $0x182] sm:$0xff] }
 0x21c   : > { %770 = vxpose.xlu0.b32.cont [12/16] (narrow) %v2340_v8, 8 }
 0x21d   : > { %868 = vxpose.xlu2.b32.cont [12/16] (narrow) %v1950_v27, 8 }
 0x21e   : > { %836 = vxpose.xlu1.b32.cont [12/16] (narrow) %v1952_v62, 8  ;;  %v2341_v62 = vld [vmem:[#allocation7_spill] sm:$0xff] }
 0x224   : > { %771 = vxpose.xlu0.b32.cont [13/16] (narrow) %v1957_v21, 8  ;;  %v2080_v21 = vld [vmem:[#allocation2 + $0x189] sm:$0xff] }
 0x225   : > { %869 = vxpose.xlu2.b32.cont [13/16] (narrow) %v1959_v57, 8  ;;  %v2082_v57 = vld [vmem:[#allocation2 + $0x18a] sm:$0xff] }
 0x226   : > { %837 = vxpose.xlu1.b32.cont [13/16] (narrow) %v1961_v30, 8 }
 0x22c   : > { %772 = vxpose.xlu0.b32.cont [14/16] (narrow) %v1966_v18, 8 }
 0x22d   : > { %870 = vxpose.xlu2.b32.cont [14/16] (narrow) %v1968_v1, 8  ;;  %v2342_v1 = vld [vmem:[#allocation8_spill] sm:$0xff] }
 0x22e   : > { %838 = vxpose.xlu1.b32.cont [14/16] (narrow) %v1970_v60, 8 }
 0x234   : > { %773 = vxpose.xlu0.b32.cont [15/16] (narrow) %v2073_v55, 8 }
 0x235   : > { %871 = vxpose.xlu2.b32.cont [15/16] (narrow) %v2075_v6, 8 }
 0x236   : > { %839 = vxpose.xlu1.b32.cont [15/16] (narrow) %v2341_v62, 8 }
 0x23c   : > { %774 = vxpose.xlu0.b32.end [16/16] (narrow) %v2080_v21, 8 }
 0x23d   : > { %872 = vxpose.xlu2.b32.end [16/16] (narrow) %v2082_v57, 8 }
 0x23e   : > { %840 = vxpose.xlu1.b32.end [16/16] (narrow) %v2342_v1, 8 }
 0x244   : > { %930 = vxpose.xlu0.b32.start [1/16] (narrow) %v1699_v28, 8  ;;  %v910_v28 = vld [vmem:[#allocation2 + $0xc0] sm:$0xff] }
 0x245   : > { %1028 = vxpose.xlu2.b32.start [1/16] (narrow) %v1701_v29, 8  ;;  %v911_v29 = vld [vmem:[#allocation2 + $0xc8] sm:$0xff] }
 0x246   : > { %962 = vxpose.xlu1.b32.start [1/16] (narrow) %v1704_v31, 8  ;;  %v928_v31 = vld [vmem:[#allocation2 + $0x198] sm:$0xff] }
 0x24c   : > { %931 = vxpose.xlu0.b32.cont [2/16] (narrow) %v1712_v33, 8  ;;  %v929_v33 = vld [vmem:[#allocation2 + $0x1a0] sm:$0xff] }
 0x24d   : > { %1029 = vxpose.xlu2.b32.cont [2/16] (narrow) %v1714_v34, 8  ;;  %v2343_v34 = vld [vmem:[#allocation11_spill] sm:$0xff] }
 0x24e   : > { %963 = vxpose.xlu1.b32.cont [2/16] (narrow) %v1717_v36, 8  ;;  %v2344_v36 = vld [vmem:[#allocation12_spill] sm:$0xff] }
 0x254   : > { %932 = vxpose.xlu0.b32.cont [3/16] (narrow) %v1725_v38, 8  ;;  %v2345_v38 = vld [vmem:[#allocation13_spill] sm:$0xff] }
 0x255   : > { %1030 = vxpose.xlu2.b32.cont [3/16] (narrow) %v1727_v39, 8  ;;  %v2346_v39 = vld [vmem:[#allocation14_spill] sm:$0xff] }
 0x256   : > { %964 = vxpose.xlu1.b32.cont [3/16] (narrow) %v1730_v41, 8  ;;  %v2348_v41 = vld [vmem:[#allocation16_spill] sm:$0xff] }
 0x25c   : > { %933 = vxpose.xlu0.b32.cont [4/16] (narrow) %v1738_v43, 8  ;;  %v2349_v43 = vld [vmem:[#allocation17_spill] sm:$0xff] }
 0x25d   : > { %1031 = vxpose.xlu2.b32.cont [4/16] (narrow) %v1740_v44, 8  ;;  %v2351_v44 = vld [vmem:[#allocation19_spill] sm:$0xff] }
 0x25e   : > { %965 = vxpose.xlu1.b32.cont [4/16] (narrow) %v1743_v46, 8  ;;  %v2352_v46 = vld [vmem:[#allocation20_spill] sm:$0xff] }
 0x264   : > { %934 = vxpose.xlu0.b32.cont [5/16] (narrow) %v1751_v48, 8  ;;  %v2353_v48 = vld [vmem:[#allocation21_spill] sm:$0xff] }
 0x265   : > { %1032 = vxpose.xlu2.b32.cont [5/16] (narrow) %v1753_v49, 8  ;;  %v2354_v49 = vld [vmem:[#allocation22_spill] sm:$0xff] }
 0x266   : > { %966 = vxpose.xlu1.b32.cont [5/16] (narrow) %v1756_v51, 8  ;;  %v2355_v51 = vld [vmem:[#allocation23_spill] sm:$0xff] }
 0x26c   : > { %935 = vxpose.xlu0.b32.cont [6/16] (narrow) %v1764_v53, 8  ;;  %v2356_v53 = vld [vmem:[#allocation24_spill] sm:$0xff] }
 0x26d   : > { %1033 = vxpose.xlu2.b32.cont [6/16] (narrow) %v1766_v54, 8  ;;  %v2357_v54 = vld [vmem:[#allocation25_spill] sm:$0xff] }
 0x26e   : > { %967 = vxpose.xlu1.b32.cont [6/16] (narrow) %v1769_v56, 8  ;;  %v2358_v56 = vld [vmem:[#allocation26_spill] sm:$0xff] }
 0x274   : > { %936 = vxpose.xlu0.b32.cont [7/16] (narrow) %v1777_v58, 8  ;;  %v2359_v58 = vld [vmem:[#allocation35_spill] sm:$0xff] }
 0x275   : > { %1034 = vxpose.xlu2.b32.cont [7/16] (narrow) %v1779_v59, 8  ;;  %v2360_v59 = vld [vmem:[#allocation36_spill] sm:$0xff] }
 0x276   : > { %968 = vxpose.xlu1.b32.cont [7/16] (narrow) %v1782_v61, 8  ;;  %v2361_v61 = vld [vmem:[#allocation38_spill] sm:$0xff] }
 0x27c   : > { %937 = vxpose.xlu0.b32.cont [8/16] (narrow) %v1790_v63, 8  ;;  %v2362_v63 = vld [vmem:[#allocation39_spill] sm:$0xff] }
 0x27d   : > { %1035 = vxpose.xlu2.b32.cont [8/16] (narrow) %v1792_v0, 8  ;;  %v2363_v0 = vld [vmem:[#allocation40_spill] sm:$0xff] }
 0x27e   : > { %969 = vxpose.xlu1.b32.cont [8/16] (narrow) %v1795_v2, 8  ;;  %v2364_v2 = vld [vmem:[#allocation41_spill] sm:$0xff] }
 0x284   : > { %938 = vxpose.xlu0.b32.cont [9/16] (narrow) %v1801_v3, 8  ;;  %v437_v3 = vpop.trf.xlu2 }
 0x285   : > { %1036 = vxpose.xlu2.b32.cont [9/16] (narrow) %v1803_v4, 8  ;;  %v339_v4 = vpop.trf.xlu0 }
 0x286   : > { %970 = vxpose.xlu1.b32.cont [9/16] (narrow) %v1805_v5, 8  ;;  %v487_v5 = vrot.slane %v437_v3, 4  ;;  %387 = vst [vmem:[#allocation3 + $0x30] sm:$0xf] %v339_v4 }
 0x288   : > { %491 = vst [vmem:[#allocation3 + $0x30] sm:$0xf0] %v487_v5 }
 0x28c   : > { %939 = vxpose.xlu0.b32.cont [10/16] (narrow) %v1810_v7, 8  ;;  %v371_v7 = vpop.trf.xlu1 }
 0x28d   : > { %1037 = vxpose.xlu2.b32.cont [10/16] (narrow) %v1812_v9, 8  ;;  %388 = vst [vmem:[#allocation3] sm:$0xf] %v371_v7  ;;  %v573_v9 = vpop.trf.xlu2 }
 0x28e   : > { %971 = vxpose.xlu1.b32.cont [10/16] (narrow) %v1814_v10, 8  ;;  %v469_v10 = vpop.trf.xlu0  ;;  %590 = vst [vmem:[#allocation3 + $0x10] sm:$0xf] %v573_v9 }
 0x294   : > { %940 = vxpose.xlu0.b32.cont [11/16] (narrow) %v1819_v11, 8  ;;  %v488_v11 = vrot.slane %v469_v10, 4 }
 0x295   : > { %1038 = vxpose.xlu2.b32.cont [11/16] (narrow) %v1821_v12, 8  ;;  %v541_v12 = vpop.trf.xlu1 }
 0x296   : > { %972 = vxpose.xlu1.b32.cont [11/16] (narrow) %v1823_v13, 8  ;;  %589 = vst [vmem:[#allocation3 + $0x18] sm:$0xf] %v541_v12  ;;  %v743_v13 = vpop.trf.xlu2 }
 0x297   : > { %492 = vst [vmem:[#allocation3] sm:$0xf0] %v488_v11 }
 0x298   : > { %791 = vst [vmem:[#allocation3 + $0x48] sm:$0xf] %v743_v13 }
 0x29c   : > { %941 = vxpose.xlu0.b32.cont [12/16] (narrow) %v1828_v14, 8  ;;  %v639_v14 = vpop.trf.xlu0 }
 0x29d   : > { %1039 = vxpose.xlu2.b32.cont [12/16] (narrow) %v1830_v15, 8  ;;  %v689_v15 = vrot.slane %v639_v14, 4 }
 0x29e   : > { %973 = vxpose.xlu1.b32.cont [12/16] (narrow) %v1832_v16, 8  ;;  %v671_v16 = vpop.trf.xlu1 }
 0x29f   : > { %693 = vst [vmem:[#allocation3 + $0x18] sm:$0xf0] %v689_v15 }
 0x2a4   : > { %942 = vxpose.xlu0.b32.cont [13/16] (narrow) %v910_v28, 8 }
 0x2a5   : > { %1040 = vxpose.xlu2.b32.cont [13/16] (narrow) %v1837_v17, 8  ;;  %v690_v17 = vrot.slane %v671_v16, 4 }
 0x2a6   : > { %974 = vxpose.xlu1.b32.cont [13/16] (narrow) %v2021_v23, 8 }
 0x2a7   : > { %694 = vst [vmem:[#allocation3 + $0x10] sm:$0xf0] %v690_v17 }
 0x2ac   : > { %943 = vxpose.xlu0.b32.cont [14/16] (narrow) %v911_v29, 8 }
 0x2ad   : > { %1041 = vxpose.xlu2.b32.cont [14/16] (narrow) %v1843_v25, 8  ;;  %v1130_v25 = vld [vmem:[#allocation2 + $0x19a] sm:$0xff] }
 0x2ae   : > { %975 = vxpose.xlu1.b32.cont [14/16] (narrow) %v2026_v24, 8 }
 0x2b4   : > { %944 = vxpose.xlu0.b32.cont [15/16] (narrow) %v1679_v22, 8  ;;  %v2347_v22 = vld [vmem:[#allocation15_spill] sm:$0xff] }
 0x2b5   : > { %1042 = vxpose.xlu2.b32.cont [15/16] (narrow) %v1849_v32, 8  ;;  %v775_v32 = vpop.trf.xlu0 }
 0x2b6   : > { %976 = vxpose.xlu1.b32.cont [15/16] (narrow) %v928_v31, 8  ;;  %792 = vst [vmem:[#allocation3 + $0x28] sm:$0xf] %v775_v32  ;;  %v1200_v31 = vld [vmem:[#allocation3] sm:$0xff] }
 0x2bc   : > { %945 = vxpose.xlu0.b32.end [16/16] (narrow) %v1691_v26, 8  ;;  %v2350_v26 = vld [vmem:[#allocation18_spill] sm:$0xff] }
 0x2bd   : > { %1043 = vxpose.xlu2.b32.end [16/16] (narrow) %v1858_v40, 8 }
 0x2be   : > { %977 = vxpose.xlu1.b32.end [16/16] (narrow) %v929_v33, 8  ;;  %v1202_v33 = vld [vmem:[#allocation3 + $0x10] sm:$0xff] }
 0x2c4   : > { %1060 = vxpose.xlu0.b32.start [1/16] (narrow) %v1867_v47, 8 }
 0x2c5   : > { %1164 = vxpose.xlu2.b32.start [1/16] (narrow) %v2343_v34, 8 }
 0x2c6   : > { %1132 = vxpose.xlu1.b32.start [1/16] (narrow) %v2344_v36, 8 }
 0x2cc   : > { %1061 = vxpose.xlu0.b32.cont [2/16] (narrow) %v2345_v38, 8 }
 0x2cd   : > { %1165 = vxpose.xlu2.b32.cont [2/16] (narrow) %v2346_v39, 8  ;;  %v1210_v39 = vpack.c.bf16 %v1202_v33, %v1200_v31 }
 0x2ce   : > { %1133 = vxpose.xlu1.b32.cont [2/16] (narrow) %v2347_v22, 8 }
 0x2d4   : > { %1062 = vxpose.xlu0.b32.cont [3/16] (narrow) %v2348_v41, 8  ;;  %v1199_v41 = vld [vmem:[#allocation3 + $0x30] sm:$0xff] }
 0x2d5   : > { %1166 = vxpose.xlu2.b32.cont [3/16] (narrow) %v2349_v43, 8  ;;  %v1201_v43 = vld [vmem:[#allocation3 + $0x18] sm:$0xff] }
 0x2d6   : > { %1134 = vxpose.xlu1.b32.cont [3/16] (narrow) %v2350_v26, 8  ;;  %v1198_v26 = vld [vmem:[%s2216_s1] sm:$0xf] }
 0x2dc   : > { %1063 = vxpose.xlu0.b32.cont [4/16] (narrow) %v2351_v44, 8  ;;  %v1209_v44 = vpack.c.bf16 %v1201_v43, %v1199_v41 }
 0x2dd   : > { %1167 = vxpose.xlu2.b32.cont [4/16] (narrow) %v2352_v46, 8  ;;  %v1461_v46 = vmov 0  }
 0x2de   : > { %1135 = vxpose.xlu1.b32.cont [4/16] (narrow) %v2353_v48, 8  ;;  %v1215_v48 = vld [vmem:[%s2217_s2] sm:$0xff] }
 0x2e4   : > { %1064 = vxpose.xlu0.b32.cont [5/16] (narrow) %v2354_v49, 8 }
 0x2e5   : > { %1168 = vxpose.xlu2.b32.cont [5/16] (narrow) %v2355_v51, 8 }
 0x2e6   : > { %1136 = vxpose.xlu1.b32.cont [5/16] (narrow) %v2356_v53, 8 }
 0x2ec   : > { %1065 = vxpose.xlu0.b32.cont [6/16] (narrow) %v2357_v54, 8 }
 0x2ed   : > { %1169 = vxpose.xlu2.b32.cont [6/16] (narrow) %v2358_v56, 8 }
 0x2ee   : > { %1137 = vxpose.xlu1.b32.cont [6/16] (narrow) %v2330_v19, 8 }
 0x2f4   : > { %1066 = vxpose.xlu0.b32.cont [7/16] (narrow) %v2331_v37, 8 }
 0x2f5   : > { %1170 = vxpose.xlu2.b32.cont [7/16] (narrow) %v2332_v20, 8 }
 0x2f6   : > { %1138 = vxpose.xlu1.b32.cont [7/16] (narrow) %v2333_v42, 8  ;;  %v841_v42 = vpop.trf.xlu1 }
 0x2f7   : > { %v891_v47 = vrot.slane %v841_v42, 4 }
 0x2f9   : > { %895 = vst [vmem:[#allocation3 + $0x48] sm:$0xf0] %v891_v47 }
 0x2fc   : > { %1067 = vxpose.xlu0.b32.cont [8/16] (narrow) %v2334_v45, 8 }
 0x2fd   : > { %1171 = vxpose.xlu2.b32.cont [8/16] (narrow) %v2335_v35, 8  ;;  %v2365_v35 = vld [vmem:[#allocation9_spill] sm:$0xff] }
 0x2fe   : > { %1139 = vxpose.xlu1.b32.cont [8/16] (narrow) %v2336_v50, 8  ;;  %v1027_v50 = vld [vmem:[#allocation2 + $0x1a1] sm:$0xff] }
 0x300   : > { %v1203_v36 = vld [vmem:[#allocation3 + $0x48] sm:$0xff] }
 0x304   : > { %1068 = vxpose.xlu0.b32.cont [9/16] (narrow) %v2337_v52, 8  ;;  %v1131_v52 = vld [vmem:[#allocation2 + $0x1a2] sm:$0xff] }
 0x305   : > { %1172 = vxpose.xlu2.b32.cont [9/16] (narrow) %v2359_v58, 8 }
 0x306   : > { %1140 = vxpose.xlu1.b32.cont [9/16] (narrow) %v2360_v59, 8 }
 0x30c   : > { %1069 = vxpose.xlu0.b32.cont [10/16] (narrow) %v2340_v8, 8 }
 0x30d   : > { %1173 = vxpose.xlu2.b32.cont [10/16] (narrow) %v1950_v27, 8  ;;  %v873_v27 = vpop.trf.xlu2 }
 0x30e   : > { %1141 = vxpose.xlu1.b32.cont [10/16] (narrow) %v2361_v61, 8  ;;  %v892_v40 = vrot.slane %v873_v27, 4 }
 0x310   : > { %896 = vst [vmem:[#allocation3 + $0x28] sm:$0xf0] %v892_v40 }
 0x314   : > { %1070 = vxpose.xlu0.b32.cont [11/16] (narrow) %v2362_v63, 8 }
 0x315   : > { %1174 = vxpose.xlu2.b32.cont [11/16] (narrow) %v2363_v0, 8 }
 0x316   : > { %1142 = vxpose.xlu1.b32.cont [11/16] (narrow) %v1961_v30, 8 }
 0x317   : > { %v1204_v37 = vld [vmem:[#allocation3 + $0x28] sm:$0xff] }
 0x31c   : > { %1071 = vxpose.xlu0.b32.cont [12/16] (narrow) %v1966_v18, 8  ;;  %v1026_v18 = vld [vmem:[#allocation2 + $0x199] sm:$0xff] }
 0x31d   : > { %1175 = vxpose.xlu2.b32.cont [12/16] (narrow) %v2364_v2, 8 }
 0x31e   : > { %1143 = vxpose.xlu1.b32.cont [12/16] (narrow) %v1970_v60, 8  ;;  %v2366_v60 = vld [vmem:[#allocation10_spill] sm:$0xff] }
 0x324   : > { %1072 = vxpose.xlu0.b32.cont [13/16] (narrow) %v2073_v55, 8  ;;  %v1044_v55 = vpop.trf.xlu2 }
 0x325   : > { %1176 = vxpose.xlu2.b32.cont [13/16] (narrow) %v2075_v6, 8 }
 0x326   : > { %1144 = vxpose.xlu1.b32.cont [13/16] (narrow) %v2341_v62, 8  ;;  %v1094_v62 = vrot.slane %v1044_v55, 4 }
 0x328   : > { %1098 = vst [vmem:[#allocation3 + $0x8] sm:$0xf0] %v1094_v62 }
 0x32c   : > { %1073 = vxpose.xlu0.b32.cont [14/16] (narrow) %v2080_v21, 8 }
 0x32d   : > { %1177 = vxpose.xlu2.b32.cont [14/16] (narrow) %v2082_v57, 8  ;;  %v946_v57 = vpop.trf.xlu0 }
 0x32e   : > { %1145 = vxpose.xlu1.b32.cont [14/16] (narrow) %v2342_v1, 8  ;;  %994 = vst [vmem:[#allocation3 + $0x8] sm:$0xf] %v946_v57  ;;  %v978_v1 = vpop.trf.xlu1 }
 0x32f   : > { %995 = vst [vmem:[#allocation3 + $0x20] sm:$0xf] %v978_v1 }
 0x334   : > { %1074 = vxpose.xlu0.b32.cont [15/16] (narrow) %v1026_v18, 8 }
 0x335   : > { %1178 = vxpose.xlu2.b32.cont [15/16] (narrow) %v1130_v25, 8  ;;  %v1205_v38 = vld [vmem:[#allocation3 + $0x8] sm:$0xff] }
 0x336   : > { %1146 = vxpose.xlu1.b32.cont [15/16] (narrow) %v2365_v35, 8  ;;  %v1211_v22 = vpack.c.bf16 %v1205_v38, %v1203_v36 }
 0x33c   : > { %1075 = vxpose.xlu0.b32.end [16/16] (narrow) %v1027_v50, 8 }
 0x33d   : > { %1179 = vxpose.xlu2.b32.end [16/16] (narrow) %v1131_v52, 8 }
 0x33e   : > { %1147 = vxpose.xlu1.b32.end [16/16] (narrow) %v2366_v60, 8 }
 0x35e   : > { %v1180_v21 = vpop.trf.xlu2 }
 0x35f   : > { %1197 = vst [vmem:[#allocation3 + $0x38] sm:$0xf] %v1180_v21 }
 0x366   : > { %v1208_v30 = vld [vmem:[#allocation3 + $0x38] sm:$0xf] }
 0x367   : > { %v1214_v23 = vpack.c.bf16 %v1208_v30, %v1208_v30 }
 0x368   : > { %v1076_v24 = vpop.trf.xlu0 }
 0x369   : > { %v1230_v6 = vsel %vm1225_vm2, %v1214_v23, 0  ;;  %v1095_v8 = vrot.slane %v1076_v24, 4 }
 0x36a   : > { %v1148_v19 = vpop.trf.xlu1  ;;  %1250 = vmatpush.bf16.msra.mxu1 %v1230_v6 }
 0x36b   : > { %1196 = vst [vmem:[#allocation3 + $0x40] sm:$0xf] %v1148_v19 }
 0x36c   : > { %1099 = vst [vmem:[#allocation3 + $0x20] sm:$0xf0] %v1095_v8 }
 0x372   : > { %v1207_v20 = vld [vmem:[#allocation3 + $0x40] sm:$0xf] }
 0x373   : > { %v1206_v45 = vld [vmem:[#allocation3 + $0x20] sm:$0xff]  ;;  %v1213_v28 = vpack.c.bf16 %v1207_v20, %v1207_v20 }
 0x374   : > { %v1212_v29 = vpack.c.bf16 %v1206_v45, %v1204_v37 }
 0x375   : > { %v1227_v34 = vsel %vm1225_vm2, %v1213_v28, 0 }
 0x376   : > { %1251 = vmatpush.bf16.msra.mxu1 %v1212_v29  ;;  %1237 = vmatpush.bf16.msra.mxu0 %v1227_v34 }
 0x37a   : > { %1252 = vmatpush.bf16.msra.mxu1 %v1210_v39  ;;  %1238 = vmatpush.bf16.msra.mxu0 %v1211_v22 }
 0x37d   : > { %1346 = vmatmul.msk.bf16.vlgmr.msra.gmra.mxu1 %vm1221_vm3, %v1198_v26 }
 0x37e   : > { %1239 = vmatpush.bf16.msra.mxu0 %v1209_v44 }
 0x381   : > { %1345 = vmatmul.msk.bf16.vlgmr.msra.gmra.mxu0 %vm1221_vm3, %v1198_v26 }
 0x3a3   : > { %1395 = vset.pattern.permute.xlu0 %v1461_v46 }
 0x3aa   : > { %1218 = vperm.xlu0 %1395, %v1215_v48  }
 0x3fa   : > { %v1254_v49 = vpop.f32.mrf.mxu1 }
 0x3fe   : > { %v1241_v51 = vpop.f32.mrf.mxu0 }
 0x402   : > { %v1256_v53 = vpop.f32.mrf.mxu1 }
 0x406   : > { %v1243_v54 = vpop.f32.mrf.mxu0 }
 0x41c   : > { %v1219_v56 = vpop.permute.xlu0 %1218 }
 0x41d   : > { %v1242_v58 = vadd.f32 %v1241_v51, %v1219_v56  ;;  %v1255_v59 = vadd.f32 %v1254_v49, %v1219_v56 }
 0x41f   : > { %v1258_v61 = vmax.f32 %v1242_v58, 0.0  ;;  %v1259_v63 = vmax.f32 %v1255_v59, 0.0 }
 0x421   : > { %1260 = vst [vmem:[%s163_s17] sm:$0xff] %v1258_v61 }
 0x422   : > { %1261 = vst [vmem:[%s163_s17 + $0x8] sm:$0xff] %v1259_v63 }
 0x423   : > { %1423 = shalt.err (!%p1420_p3)
}
 0x424   : > { %1354 = dma.vmem_to_hbm [thread:$0]  (%p1520_p5), %s1277_s19, 256, %s1279_s20, %s1263_s24  }
 0x425 PF: > { %p1360_p4 = scmp.ge.s32.totalorder %s1458_s15, 2  ;;  %s1290_s4 = sand.u32 1, %s1446_s12  }
 0x426   : > { %s1291_s5 = scalar_lea.sflag [#allocation5], %s1290_s4 }
 0x427   : > { %p1357_p7 = pnand %p1360_p4, %p1524_p6 }
 0x429   : > { %p1358_p8 = pneg %p1357_p7 }
 0x42b   : > { %1441 = dma.done.wait (%p1358_p8), %s1291_s5, 256  }
 0x42c   : > { %1443 = vsyncadd (%p1358_p8), %s1291_s5, 4294967040  ;;  %p13_p9 = scmp.ge.s32.totalorder %s1507_s18, 4   ;;  %s2367_s12 = smov %s1450_s13 }
 0x42d   : > { %s2368_s13 = smov %s1454_s14  ;;  %s2369_s14 = smov %s1518_s21 }
 0x42e   : > { %s2370_s15 = smov %s1507_s18  ;;  %15 = sbr.rel (!%p13_p9) target bundleno = 3 (0x3), region = 69 }
 0x433   :  { %1297 = vsyncpa [#allocation5], 1 }
 0x434   :  { %1299 = vsyncpa [#allocation5 + $0x1], 1 }

</bundles_post_ra>
